<compile_context>
chip_gen: v5e
topology: v5e:2x2
jax: 0.10.0
libtpu: 0.0.40
codegen_flags: <defaults>
</compile_context>

<pallas_src>
import functools
import math

import jax
import jax.numpy as jnp
from jax import lax
from jax.experimental import pallas as pl
from jax.experimental.pallas import tpu as pltpu

LANE = 128       # f32 lane width
SUBLANE = 8      # f32 sublane width
MAX_TIME_CHUNK = 16


# ---------------------------------------------------------------------------
# Layout / sizing helpers
# ---------------------------------------------------------------------------

def _round_up(x, m):
    return ((x + m - 1) // m) * m


def _gate_layout(H):
    """Returns (hs, Gp): gate stride == hidden-state width, packed gate width.

    H multiple of 128 -> hs = H (already lane aligned).
    H <= 128          -> hs = H (gates packed contiguously; sub-128-lane slices
                                 are far cheaper than 4-16x padded MXU work).
    else              -> hs = round_up(H, 128) (lane-aligned gate slices).
    """
    Hp = _round_up(H, LANE)
    hs = H if (Hp == H or H <= LANE) else Hp
    return hs, _round_up(4 * hs, LANE)


def _vmem_capacity_bytes():
    try:
        cap = getattr(pltpu.get_tpu_info(), "vmem_capacity_bytes", None)
        if cap:
            return int(cap)
    except Exception:
        pass
    return 64 * 1024 * 1024          # conservative fallback (v7x physical)


def _num_tensorcores():
    try:
        kind = jax.devices()[0].device_kind.lower()
    except Exception:
        return 1
    return 2 if ("v7" in kind or "7x" in kind) else 1


def _batch_split(Bp):
    """Split batch across cores only on 2-TC parts (v7x) with useful M/half."""
    if _num_tensorcores() >= 2 and Bp % (2 * SUBLANE) == 0 and Bp // 2 >= 64:
        return 2
    return 1


def _vmem_estimate(tb, bb, D, hs, Gp, L, mxu_b):
    est = 2 * tb * bb * D * 4                       # x pipeline double-buffer (f32)
    est += 2 * L * bb * hs * 4                      # hn output block
    for l in range(L):
        dl = D if l == 0 else hs
        est += 2 * (dl + hs) * Gp * mxu_b + 2 * Gp * 4   # weights + bias
    est += 2 * L * bb * hs * 4                      # h / c state scratch
    est += tb * bb * hs * mxu_b                     # inter-layer activation slab
    est += tb * bb * Gp * 4                         # hoisted gate pre-activations
    return est


# ---------------------------------------------------------------------------
# Pallas kernels
# ---------------------------------------------------------------------------

def fused_lstm_kernel(x_ref, *args, tb, hs, n_layers, t_total):
    """All LSTM layers, one (batch-block, time-chunk) grid step.

    Grid: (batch_blocks, time_chunks) -- time is sequential; state lives in
    VMEM scratch and is re-initialized whenever the time index restarts.

    x_ref            : (tb, bb, D)        input slab for this time chunk
    per layer l      : w_ih (D_l, Gp), w_hh (hs, Gp), bias (1, Gp)
    hn_ref (output)  : (L, bb, hs)        final hidden state of every layer
    h_sc / c_sc      : (L, bb, hs) f32    recurrent state
    act_sc           : (tb*bb, hs)        inter-layer activations (MXU dtype)
    gx_sc            : (tb*bb, Gp) f32    hoisted x@W_ih + bias for the chunk
    """
    w_refs = args[:3 * n_layers]
    hn_ref = args[3 * n_layers]
    h_sc, c_sc, act_sc, gx_sc = args[3 * n_layers + 1:]

    t_chunk = pl.program_id(1)

    @pl.when(t_chunk == 0)
    def _init():
        h_sc[...] = jnp.zeros_like(h_sc)
        c_sc[...] = jnp.zeros_like(c_sc)

    bb = h_sc.shape[1]
    ragged = (t_total % tb) != 0           # static: only true when T was padded

    for l in range(n_layers):
        w_ih = w_refs[3 * l][...]
        w_hh = w_refs[3 * l + 1][...]
        bias = w_refs[3 * l + 2][...]
        mxu_dtype = w_hh.dtype
        last_layer = l == n_layers - 1

        # Hoisted input projection: one (tb*bb, D_l) x (D_l, Gp) GEMM per chunk,
        # bias folded in, result staged in VMEM scratch (keeps vregs free).
        if l == 0:
            xin = x_ref[...].astype(mxu_dtype).reshape(tb * bb, -1)
        else:
            xin = act_sc[...]
        gx_sc[...] = jnp.dot(xin, w_ih, preferred_element_type=jnp.float32) + bias

        def step(t, carry, w_hh=w_hh, mxu_dtype=mxu_dtype, last_layer=last_layer):
            h, c = carry
            row = pl.multiple_of(t * bb, bb)
            # Critical path per timestep: one (bb, hs) x (hs, Gp) matmul.
            pre = gx_sc[pl.ds(row, bb), :] + jnp.dot(
                h.astype(mxu_dtype), w_hh, preferred_element_type=jnp.float32)
            # Stored gate order is (i, f, o, g): one EUP tanh covers the three
            # sigmoid gates via sigmoid(x) = 0.5*tanh(0.5*x) + 0.5.
            sg = 0.5 * jnp.tanh(0.5 * pre[:, 0:3 * hs]) + 0.5
            i_g = sg[:, 0:hs]
            f_g = sg[:, hs:2 * hs]
            o_g = sg[:, 2 * hs:3 * hs]
            g_g = jnp.tanh(pre[:, 3 * hs:4 * hs])
            c_new = f_g * c + i_g * g_g            # state math stays f32
            h_new = o_g * jnp.tanh(c_new)
            if not last_layer:
                act_sc[pl.ds(row, bb), :] = h_new.astype(act_sc.dtype)
            if ragged:
                keep = (t_chunk * tb + t) < t_total
                h_new = jnp.where(keep, h_new, h)
                c_new = jnp.where(keep, c_new, c)
            return h_new, c_new

        h, c = lax.fori_loop(0, tb, step, (h_sc[l], c_sc[l]), unroll=True)
        h_sc[l] = h
        c_sc[l] = c

    hn_ref[...] = h_sc[...]


def head_kernel(h_ref, w1_ref, b1_ref, w2_ref, b2_ref, o_ref):
    """relu -> fc_1 -> relu -> fc, fully VMEM resident, lane-dense output."""
    h = jnp.maximum(h_ref[...], 0.0)
    z = jnp.dot(h, w1_ref[...], preferred_element_type=jnp.float32) + b1_ref[...]
    z = jnp.maximum(z, 0.0)
    out = jnp.dot(z, w2_ref[...], preferred_element_type=jnp.float32) + b2_ref[...]
    o_ref[...] = out.astype(o_ref.dtype)


# ---------------------------------------------------------------------------
# Forward wrapper
# ---------------------------------------------------------------------------

def lstm1_forward(x, packed):
    """x: (B, T, D) batch-first like the PyTorch module. Returns (L*B, C)."""
    mxu_dtype = packed["mxu_dtype"]
    B, T, D = x.shape
    hs, Gp = packed["hs"], packed["g4"]
    C, Cp = packed["C"], packed["Cp"]
    L = len(packed["lstm"])
    Bp = _round_up(B, SUBLANE)

    n_bb = _batch_split(Bp)
    bb = Bp // n_bb

    # Time-chunk size from a VMEM budget (v7x: 64 MiB physical; v5e/v6e: 128).
    mxu_b = jnp.dtype(mxu_dtype).itemsize
    cap = _vmem_capacity_bytes()
    budget = cap // 2
    tb = min(T, MAX_TIME_CHUNK)
    while tb > 1 and _vmem_estimate(tb, bb, D, hs, Gp, L, mxu_b) > budget:
        tb -= 1
    n_chunks = (T + tb - 1) // tb
    Tp = n_chunks * tb
    est = _vmem_estimate(tb, bb, D, hs, Gp, L, mxu_b)
    vmem_limit = int(min(cap, max(32 * 2**20, int(est * 1.5))))

    x_tm = jnp.transpose(x, (1, 0, 2))                         # (T, B, D)
    if Bp != B or Tp != T:
        x_tm = jnp.pad(x_tm, ((0, Tp - T), (0, Bp - B), (0, 0)))

    kernel = functools.partial(fused_lstm_kernel, tb=tb, hs=hs,
                               n_layers=L, t_total=T)

    weight_inputs = []
    in_specs = [pl.BlockSpec((tb, bb, D), lambda bi, ti: (ti, bi, 0))]
    for (w_ih, w_hh, b) in packed["lstm"]:
        weight_inputs += [w_ih, w_hh, b]
        in_specs += [
            pl.BlockSpec(w_ih.shape, lambda bi, ti: (0, 0)),
            pl.BlockSpec(w_hh.shape, lambda bi, ti: (0, 0)),
            pl.BlockSpec(b.shape, lambda bi, ti: (0, 0)),
        ]

    batch_sem = pltpu.CORE_PARALLEL if n_bb > 1 else pltpu.ARBITRARY

    hn = pl.pallas_call(
        kernel,
        out_shape=jax.ShapeDtypeStruct((L, Bp, hs), jnp.float32),
        grid_spec=pltpu.PrefetchScalarGridSpec(
            num_scalar_prefetch=0,
            grid=(n_bb, n_chunks),
            in_specs=in_specs,
            out_specs=pl.BlockSpec((L, bb, hs), lambda bi, ti: (0, bi, 0)),
            scratch_shapes=[
                pltpu.VMEM((L, bb, hs), jnp.float32),     # h state (f32)
                pltpu.VMEM((L, bb, hs), jnp.float32),     # c state (f32)
                pltpu.VMEM((tb * bb, hs), mxu_dtype),     # inter-layer activations
                pltpu.VMEM((tb * bb, Gp), jnp.float32),   # hoisted gate pre-acts
            ],
        ),
        compiler_params=pltpu.CompilerParams(
            dimension_semantics=(batch_sem, pltpu.ARBITRARY),
            vmem_limit_bytes=vmem_limit),
    )(x_tm, *weight_inputs)

    # MLP head on the batch-padded hidden block; class dim lane-padded to Cp.
    hn_flat = hn.reshape(L * Bp, hs)
    out_p = pl.pallas_call(
        head_kernel,
        out_shape=jax.ShapeDtypeStruct((L * Bp, Cp), jnp.float32),
    )(hn_flat, packed["w1"], packed["b1"], packed["w2"], packed["b2"])

    # hn.view(-1, H) in torch is layer-major (L, B); strip batch/class padding.
    return out_p.reshape(L, Bp, Cp)[:, :B, :C].reshape(L * B, C)


# ---------------------------------------------------------------------------
# Parameters: logical (torch-layout) init + one-time kernel-layout packing
# ---------------------------------------------------------------------------

def xavier_uniform(key, fan_in, fan_out, shape):
    bound = math.sqrt(6.0 / (fan_in + fan_out))
    return jax.random.uniform(key, shape, jnp.float32, -bound, bound)


def orthogonal_hh(key, H):
    """(H, 4H): an HxH orthogonal block per gate (Keras-like orthogonal init)."""
    blocks = []
    for k in jax.random.split(key, 4):
        a = jax.random.normal(k, (H, H), jnp.float32)
        q, r = jnp.linalg.qr(a)
        q = q * jnp.sign(jnp.diagonal(r))
        blocks.append(q)
    return jnp.concatenate(blocks, axis=1)


def init_params(key, input_size, hidden_size, num_layers, num_classes):
    """Logical parameters in torch gate order (i, f, g, o), unpadded, f32."""
    H = hidden_size
    params = {"lstm": [], "hidden_size": H, "num_classes": num_classes}
    for layer in range(num_layers):
        key, k_ih, k_hh = jax.random.split(key, 3)
        d = input_size if layer == 0 else H
        w_ih = xavier_uniform(k_ih, d, 4 * H, (d, 4 * H))     # (D_l, 4H)
        w_hh = orthogonal_hh(k_hh, H)                         # (H, 4H)
        # bias_ih: zeros except forget gate [H:2H] = 1 ; bias_hh: zeros.
        b = jnp.zeros((1, 4 * H), jnp.float32).at[0, H:2 * H].set(1.0)
        params["lstm"].append((w_ih, w_hh, b))
    key, k1, k2 = jax.random.split(key, 3)
    params["w1"] = xavier_uniform(k1, H, 128, (H, 128))
    params["b1"] = jnp.zeros((1, 128), jnp.float32)
    params["w2"] = xavier_uniform(k2, 128, num_classes, (128, num_classes))
    params["b2"] = jnp.zeros((1, num_classes), jnp.float32)
    return params


_STORED_GATE_ORDER = (0, 1, 3, 2)   # stored layout: i, f, o, g (torch: i, f, g, o)


def _pack_gate_cols(w, H, hs, Gp):
    out = jnp.zeros((w.shape[0], Gp), w.dtype)
    for slot, g in enumerate(_STORED_GATE_ORDER):
        out = out.at[:, slot * hs: slot * hs + H].set(w[:, g * H:(g + 1) * H])
    return out


def _pad_rows(w, rows):
    return jnp.pad(w, ((0, rows - w.shape[0]), (0, 0)))


def pack_params(params, mxu_dtype):
    """One-time packing/casting of weights to kernel layout (pre-cast to MXU dtype)."""
    H = params["hidden_size"]
    C = params["num_classes"]
    hs, Gp = _gate_layout(H)
    Cp = _round_up(C, LANE)
    packed = {"hs": hs, "g4": Gp, "C": C, "Cp": Cp, "mxu_dtype": mxu_dtype,
              "lstm": []}
    for li, (w_ih, w_hh, b) in enumerate(params["lstm"]):
        w_ih_p = _pack_gate_cols(w_ih, H, hs, Gp)
        if li > 0:
            w_ih_p = _pad_rows(w_ih_p, hs)
        packed["lstm"].append((
            w_ih_p.astype(mxu_dtype),                               # (D_l, Gp)
            _pad_rows(_pack_gate_cols(w_hh, H, hs, Gp), hs).astype(mxu_dtype),
            _pack_gate_cols(b, H, hs, Gp).astype(jnp.float32),      # (1, Gp)
        ))
    packed["w1"] = _pad_rows(params["w1"], hs).astype(jnp.float32)  # (hs, 128)
    packed["b1"] = params["b1"].astype(jnp.float32)
    packed["w2"] = jnp.pad(params["w2"], ((0, 0), (0, Cp - C))).astype(jnp.float32)
    packed["b2"] = jnp.pad(params["b2"], ((0, 0), (0, Cp - C))).astype(jnp.float32)
    return packed


# ---------------------------------------------------------------------------
# Pure-JAX reference (torch gate order / layout)
# ---------------------------------------------------------------------------

def lstm1_reference(x, params):
    H = params["hidden_size"]
    B, T, _ = x.shape
    layer_in = x
    hn = []
    for (w_ih, w_hh, b) in params["lstm"]:
        h = jnp.zeros((B, H), jnp.float32)
        c = jnp.zeros((B, H), jnp.float32)
        outs = []
        for t in range(T):
            gates = layer_in[:, t, :] @ w_ih + h @ w_hh + b
            i_g = jax.nn.sigmoid(gates[:, 0 * H:1 * H])
            f_g = jax.nn.sigmoid(gates[:, 1 * H:2 * H])
            g_g = jnp.tanh(gates[:, 2 * H:3 * H])
            o_g = jax.nn.sigmoid(gates[:, 3 * H:4 * H])
            c = f_g * c + i_g * g_g
            h = o_g * jnp.tanh(c)
            outs.append(h)
        layer_in = jnp.stack(outs, axis=1)
        hn.append(h)
    hn_flat = jnp.concatenate(hn, axis=0)                      # (L*B, H)
    z = jnp.maximum(jnp.maximum(hn_flat, 0.0) @ params["w1"] + params["b1"], 0.0)
    return z @ params["w2"] + params["b2"]


# ---------------------------------------------------------------------------
# Main
# ---------------------------------------------------------------------------

if __name__ == "__main__":
    batch = 2
    seq_length = 8
    input_size = 4
    hidden_size = 32
    num_layers = 2
    num_classes = 3

    key = jax.random.PRNGKey(0)
    key, kx = jax.random.split(key)
    x = jax.random.normal(kx, (batch, seq_length, input_size), jnp.float32)
    params = init_params(key, input_size, hidden_size, num_layers, num_classes)

    # bf16 MXU operands on every TPU generation; gate/state math stays f32.
    packed_bf16 = pack_params(params, jnp.bfloat16)
    out = jax.block_until_ready(lstm1_forward(x, packed_bf16))
    assert out.shape == (num_layers * batch, num_classes)
    assert bool(jnp.all(jnp.isfinite(out)))

    # Numerical self-checks vs pure JAX: exact-ish on the f32-operand path,
    # T-dependent tolerance on the bf16 path (h is rounded through W_hh T times).
    ref = lstm1_reference(x, params)
    packed_f32 = pack_params(params, jnp.float32)
    out_f32 = jax.block_until_ready(lstm1_forward(x, packed_f32))
    assert jnp.allclose(out_f32, ref, rtol=2e-2, atol=2e-2), "f32 kernel/reference mismatch"

    bf16_tol = 0.02 + 0.03 * math.sqrt(seq_length)
    assert jnp.allclose(out, ref, rtol=bf16_tol, atol=bf16_tol), "bf16 kernel drift too large"

    print("KERNEL_OK")
</pallas_src>

<mosaic_0001>
module attributes {stable_mosaic.version = 11 : i64} {
  func.func @fused_lstm_kernel(%arg0: i32, %arg1: i32, %arg2: memref<8x8x4xf32, #tpu.memory_space<vmem>>, %arg3: memref<4x128xbf16, #tpu.memory_space<vmem>>, %arg4: memref<32x128xbf16, #tpu.memory_space<vmem>>, %arg5: memref<1x128xf32, #tpu.memory_space<vmem>>, %arg6: memref<32x128xbf16, #tpu.memory_space<vmem>>, %arg7: memref<32x128xbf16, #tpu.memory_space<vmem>>, %arg8: memref<1x128xf32, #tpu.memory_space<vmem>>, %arg9: memref<2x8x32xf32, #tpu.memory_space<vmem>>, %arg10: memref<2x8x32xf32, #tpu.memory_space<vmem>>, %arg11: memref<2x8x32xf32, #tpu.memory_space<vmem>>, %arg12: memref<64x32xbf16, #tpu.memory_space<vmem>>, %arg13: memref<64x128xf32, #tpu.memory_space<vmem>>) attributes {dimension_semantics = [#tpu.dimension_semantics<arbitrary>, #tpu.dimension_semantics<arbitrary>], iteration_bounds = array<i64: 1, 1>, scalar_prefetch = 0 : i64, scratch_operands = 4 : i64, tpu.core_type = #tpu.core_type<tc>, window_params = [{transform_indices = @transform_0, window_bounds = array<i64: 8, 8, 4>}, {pipeline_mode = #tpu.pipeline_mode<synchronous>, transform_indices = @transform_1, window_bounds = array<i64: 4, 128>}, {pipeline_mode = #tpu.pipeline_mode<synchronous>, transform_indices = @transform_2, window_bounds = array<i64: 32, 128>}, {pipeline_mode = #tpu.pipeline_mode<synchronous>, transform_indices = @transform_3, window_bounds = array<i64: 1, 128>}, {pipeline_mode = #tpu.pipeline_mode<synchronous>, transform_indices = @transform_4, window_bounds = array<i64: 32, 128>}, {pipeline_mode = #tpu.pipeline_mode<synchronous>, transform_indices = @transform_5, window_bounds = array<i64: 32, 128>}, {pipeline_mode = #tpu.pipeline_mode<synchronous>, transform_indices = @transform_6, window_bounds = array<i64: 1, 128>}, {transform_indices = @transform_7, window_bounds = array<i64: 2, 8, 32>}]} {
    %c0_i32 = arith.constant 0 : i32
    %0 = arith.cmpi eq, %arg1, %c0_i32 : i32
    %1 = arith.extui %0 : i1 to i32
    %c0_i32_0 = arith.constant 0 : i32
    %2 = arith.cmpi ne, %1, %c0_i32_0 : i32
    scf.if %2 {
      %cst_165 = arith.constant 0.000000e+00 : f32
      %467 = vector.broadcast %cst_165 : f32 to vector<2x8x32xf32>
      %c0_166 = arith.constant 0 : index
      %c0_167 = arith.constant 0 : index
      %c0_168 = arith.constant 0 : index
      %468 = vector.load %arg10[%c0_166, %c0_167, %c0_168] : memref<2x8x32xf32, #tpu.memory_space<vmem>>, vector<2x8x32xf32>
      tpu.vector_store %arg10[%c0_166, %c0_167, %c0_168], %467 {strides = array<i32>} : memref<2x8x32xf32, #tpu.memory_space<vmem>>, vector<2x8x32xf32>,
      %cst_169 = arith.constant 0.000000e+00 : f32
      %469 = vector.broadcast %cst_169 : f32 to vector<2x8x32xf32>
      %c0_170 = arith.constant 0 : index
      %c0_171 = arith.constant 0 : index
      %c0_172 = arith.constant 0 : index
      %470 = vector.load %arg11[%c0_170, %c0_171, %c0_172] : memref<2x8x32xf32, #tpu.memory_space<vmem>>, vector<2x8x32xf32>
      tpu.vector_store %arg11[%c0_170, %c0_171, %c0_172], %469 {strides = array<i32>} : memref<2x8x32xf32, #tpu.memory_space<vmem>>, vector<2x8x32xf32>,
    } else {
    }
    %c0 = arith.constant 0 : index
    %c0_1 = arith.constant 0 : index
    %3 = vector.load %arg3[%c0, %c0_1] : memref<4x128xbf16, #tpu.memory_space<vmem>>, vector<4x128xbf16>
    %c0_2 = arith.constant 0 : index
    %c0_3 = arith.constant 0 : index
    %4 = vector.load %arg4[%c0_2, %c0_3] : memref<32x128xbf16, #tpu.memory_space<vmem>>, vector<32x128xbf16>
    %c0_4 = arith.constant 0 : index
    %c0_5 = arith.constant 0 : index
    %5 = vector.load %arg5[%c0_4, %c0_5] : memref<1x128xf32, #tpu.memory_space<vmem>>, vector<1x128xf32>
    %c0_6 = arith.constant 0 : index
    %c0_7 = arith.constant 0 : index
    %c0_8 = arith.constant 0 : index
    %6 = vector.load %arg2[%c0_6, %c0_7, %c0_8] : memref<8x8x4xf32, #tpu.memory_space<vmem>>, vector<8x8x4xf32>
    %7 = arith.truncf %6 : vector<8x8x4xf32> to vector<8x8x4xbf16>
    %8 = vector.shape_cast %7 : vector<8x8x4xbf16> to vector<64x4xbf16>
    %cst = arith.constant dense<0.000000e+00> : vector<64x128xf32>
    %9 = tpu.matmul %8, %3, %cst {dimension_numbers = #tpu.dot_dimension_numbers<[1], [0], [0], [1], [0, 0, 1, 1], [], []>} : vector<64x4xbf16>, vector<4x128xbf16>, vector<64x128xf32> -> vector<64x128xf32>
    %10 = vector.broadcast %5 : vector<1x128xf32> to vector<64x128xf32>
    %11 = arith.addf %9, %10 : vector<64x128xf32>
    %c0_9 = arith.constant 0 : index
    %c0_10 = arith.constant 0 : index
    %12 = vector.load %arg13[%c0_9, %c0_10] : memref<64x128xf32, #tpu.memory_space<vmem>>, vector<64x128xf32>
    tpu.vector_store %arg13[%c0_9, %c0_10], %11 {strides = array<i32>} : memref<64x128xf32, #tpu.memory_space<vmem>>, vector<64x128xf32>,
    %c0_11 = arith.constant 0 : index
    %c0_12 = arith.constant 0 : index
    %c0_13 = arith.constant 0 : index
    %13 = vector.load %arg10[%c0_11, %c0_12, %c0_13] : memref<2x8x32xf32, #tpu.memory_space<vmem>>, vector<1x8x32xf32>
    %14 = vector.shape_cast %13 : vector<1x8x32xf32> to vector<8x32xf32>
    %c0_14 = arith.constant 0 : index
    %c0_15 = arith.constant 0 : index
    %c0_16 = arith.constant 0 : index
    %15 = vector.load %arg11[%c0_14, %c0_15, %c0_16] : memref<2x8x32xf32, #tpu.memory_space<vmem>>, vector<1x8x32xf32>
    %16 = vector.shape_cast %15 : vector<1x8x32xf32> to vector<8x32xf32>
    %c0_i32_17 = arith.constant 0 : i32
    %c8_i32 = arith.constant 8 : i32
    %17 = arith.muli %c0_i32_17, %c8_i32 : i32
    %18 = tpu.assume_multiple %17, 8 : i32
    %19 = arith.index_cast %18 : i32 to index
    %c0_18 = arith.constant 0 : index
    %20 = vector.load %arg13[%19, %c0_18] : memref<64x128xf32, #tpu.memory_space<vmem>>, vector<8x128xf32>
    %21 = arith.truncf %14 : vector<8x32xf32> to vector<8x32xbf16>
    %cst_19 = arith.constant dense<0.000000e+00> : vector<8x128xf32>
    %22 = tpu.matmul %21, %4, %cst_19 {dimension_numbers = #tpu.dot_dimension_numbers<[1], [0], [0], [1], [0, 0, 1, 1], [], []>} : vector<8x32xbf16>, vector<32x128xbf16>, vector<8x128xf32> -> vector<8x128xf32>
    %23 = arith.addf %20, %22 : vector<8x128xf32>
    %24 = vector.extract_strided_slice %23 {offsets = [0, 0], sizes = [8, 96], strides = [1, 1]} : vector<8x128xf32> to vector<8x96xf32>
    %cst_20 = arith.constant 5.000000e-01 : f32
    %25 = vector.broadcast %cst_20 : f32 to vector<8x96xf32>
    %26 = arith.mulf %25, %24 : vector<8x96xf32>
    %27 = math.tanh %26 : vector<8x96xf32>
    %cst_21 = arith.constant 5.000000e-01 : f32
    %28 = vector.broadcast %cst_21 : f32 to vector<8x96xf32>
    %29 = arith.mulf %28, %27 : vector<8x96xf32>
    %cst_22 = arith.constant 5.000000e-01 : f32
    %30 = vector.broadcast %cst_22 : f32 to vector<8x96xf32>
    %31 = arith.addf %29, %30 : vector<8x96xf32>
    %32 = vector.extract_strided_slice %31 {offsets = [0, 0], sizes = [8, 32], strides = [1, 1]} : vector<8x96xf32> to vector<8x32xf32>
    %33 = vector.extract_strided_slice %31 {offsets = [0, 32], sizes = [8, 32], strides = [1, 1]} : vector<8x96xf32> to vector<8x32xf32>
    %34 = vector.extract_strided_slice %31 {offsets = [0, 64], sizes = [8, 32], strides = [1, 1]} : vector<8x96xf32> to vector<8x32xf32>
    %35 = vector.extract_strided_slice %23 {offsets = [0, 96], sizes = [8, 32], strides = [1, 1]} : vector<8x128xf32> to vector<8x32xf32>
    %36 = math.tanh %35 : vector<8x32xf32>
    %37 = arith.mulf %33, %16 : vector<8x32xf32>
    %38 = arith.mulf %32, %36 : vector<8x32xf32>
    %39 = arith.addf %37, %38 : vector<8x32xf32>
    %40 = math.tanh %39 : vector<8x32xf32>
    %41 = arith.mulf %34, %40 : vector<8x32xf32>
    %42 = arith.truncf %41 : vector<8x32xf32> to vector<8x32xbf16>
    %43 = arith.index_cast %18 : i32 to index
    %c0_23 = arith.constant 0 : index
    %44 = vector.load %arg12[%43, %c0_23] : memref<64x32xbf16, #tpu.memory_space<vmem>>, vector<8x32xbf16>
    tpu.vector_store %arg12[%43, %c0_23], %42 {strides = array<i32>} : memref<64x32xbf16, #tpu.memory_space<vmem>>, vector<8x32xbf16>,
    %c1_i32 = arith.constant 1 : i32
    %c8_i32_24 = arith.constant 8 : i32
    %45 = arith.muli %c1_i32, %c8_i32_24 : i32
    %46 = tpu.assume_multiple %45, 8 : i32
    %47 = arith.index_cast %46 : i32 to index
    %c0_25 = arith.constant 0 : index
    %48 = vector.load %arg13[%47, %c0_25] : memref<64x128xf32, #tpu.memory_space<vmem>>, vector<8x128xf32>
    %49 = arith.truncf %41 : vector<8x32xf32> to vector<8x32xbf16>
    %cst_26 = arith.constant dense<0.000000e+00> : vector<8x128xf32>
    %50 = tpu.matmul %49, %4, %cst_26 {dimension_numbers = #tpu.dot_dimension_numbers<[1], [0], [0], [1], [0, 0, 1, 1], [], []>} : vector<8x32xbf16>, vector<32x128xbf16>, vector<8x128xf32> -> vector<8x128xf32>
    %51 = arith.addf %48, %50 : vector<8x128xf32>
    %52 = vector.extract_strided_slice %51 {offsets = [0, 0], sizes = [8, 96], strides = [1, 1]} : vector<8x128xf32> to vector<8x96xf32>
    %cst_27 = arith.constant 5.000000e-01 : f32
    %53 = vector.broadcast %cst_27 : f32 to vector<8x96xf32>
    %54 = arith.mulf %53, %52 : vector<8x96xf32>
    %55 = math.tanh %54 : vector<8x96xf32>
    %cst_28 = arith.constant 5.000000e-01 : f32
    %56 = vector.broadcast %cst_28 : f32 to vector<8x96xf32>
    %57 = arith.mulf %56, %55 : vector<8x96xf32>
    %cst_29 = arith.constant 5.000000e-01 : f32
    %58 = vector.broadcast %cst_29 : f32 to vector<8x96xf32>
    %59 = arith.addf %57, %58 : vector<8x96xf32>
    %60 = vector.extract_strided_slice %59 {offsets = [0, 0], sizes = [8, 32], strides = [1, 1]} : vector<8x96xf32> to vector<8x32xf32>
    %61 = vector.extract_strided_slice %59 {offsets = [0, 32], sizes = [8, 32], strides = [1, 1]} : vector<8x96xf32> to vector<8x32xf32>
    %62 = vector.extract_strided_slice %59 {offsets = [0, 64], sizes = [8, 32], strides = [1, 1]} : vector<8x96xf32> to vector<8x32xf32>
    %63 = vector.extract_strided_slice %51 {offsets = [0, 96], sizes = [8, 32], strides = [1, 1]} : vector<8x128xf32> to vector<8x32xf32>
    %64 = math.tanh %63 : vector<8x32xf32>
    %65 = arith.mulf %61, %39 : vector<8x32xf32>
    %66 = arith.mulf %60, %64 : vector<8x32xf32>
    %67 = arith.addf %65, %66 : vector<8x32xf32>
    %68 = math.tanh %67 : vector<8x32xf32>
    %69 = arith.mulf %62, %68 : vector<8x32xf32>
    %70 = arith.truncf %69 : vector<8x32xf32> to vector<8x32xbf16>
    %71 = arith.index_cast %46 : i32 to index
    %c0_30 = arith.constant 0 : index
    %72 = vector.load %arg12[%71, %c0_30] : memref<64x32xbf16, #tpu.memory_space<vmem>>, vector<8x32xbf16>
    tpu.vector_store %arg12[%71, %c0_30], %70 {strides = array<i32>} : memref<64x32xbf16, #tpu.memory_space<vmem>>, vector<8x32xbf16>,
    %c2_i32 = arith.constant 2 : i32
    %c8_i32_31 = arith.constant 8 : i32
    %73 = arith.muli %c2_i32, %c8_i32_31 : i32
    %74 = tpu.assume_multiple %73, 8 : i32
    %75 = arith.index_cast %74 : i32 to index
    %c0_32 = arith.constant 0 : index
    %76 = vector.load %arg13[%75, %c0_32] : memref<64x128xf32, #tpu.memory_space<vmem>>, vector<8x128xf32>
    %77 = arith.truncf %69 : vector<8x32xf32> to vector<8x32xbf16>
    %cst_33 = arith.constant dense<0.000000e+00> : vector<8x128xf32>
    %78 = tpu.matmul %77, %4, %cst_33 {dimension_numbers = #tpu.dot_dimension_numbers<[1], [0], [0], [1], [0, 0, 1, 1], [], []>} : vector<8x32xbf16>, vector<32x128xbf16>, vector<8x128xf32> -> vector<8x128xf32>
    %79 = arith.addf %76, %78 : vector<8x128xf32>
    %80 = vector.extract_strided_slice %79 {offsets = [0, 0], sizes = [8, 96], strides = [1, 1]} : vector<8x128xf32> to vector<8x96xf32>
    %cst_34 = arith.constant 5.000000e-01 : f32
    %81 = vector.broadcast %cst_34 : f32 to vector<8x96xf32>
    %82 = arith.mulf %81, %80 : vector<8x96xf32>
    %83 = math.tanh %82 : vector<8x96xf32>
    %cst_35 = arith.constant 5.000000e-01 : f32
    %84 = vector.broadcast %cst_35 : f32 to vector<8x96xf32>
    %85 = arith.mulf %84, %83 : vector<8x96xf32>
    %cst_36 = arith.constant 5.000000e-01 : f32
    %86 = vector.broadcast %cst_36 : f32 to vector<8x96xf32>
    %87 = arith.addf %85, %86 : vector<8x96xf32>
    %88 = vector.extract_strided_slice %87 {offsets = [0, 0], sizes = [8, 32], strides = [1, 1]} : vector<8x96xf32> to vector<8x32xf32>
    %89 = vector.extract_strided_slice %87 {offsets = [0, 32], sizes = [8, 32], strides = [1, 1]} : vector<8x96xf32> to vector<8x32xf32>
    %90 = vector.extract_strided_slice %87 {offsets = [0, 64], sizes = [8, 32], strides = [1, 1]} : vector<8x96xf32> to vector<8x32xf32>
    %91 = vector.extract_strided_slice %79 {offsets = [0, 96], sizes = [8, 32], strides = [1, 1]} : vector<8x128xf32> to vector<8x32xf32>
    %92 = math.tanh %91 : vector<8x32xf32>
    %93 = arith.mulf %89, %67 : vector<8x32xf32>
    %94 = arith.mulf %88, %92 : vector<8x32xf32>
    %95 = arith.addf %93, %94 : vector<8x32xf32>
    %96 = math.tanh %95 : vector<8x32xf32>
    %97 = arith.mulf %90, %96 : vector<8x32xf32>
    %98 = arith.truncf %97 : vector<8x32xf32> to vector<8x32xbf16>
    %99 = arith.index_cast %74 : i32 to index
    %c0_37 = arith.constant 0 : index
    %100 = vector.load %arg12[%99, %c0_37] : memref<64x32xbf16, #tpu.memory_space<vmem>>, vector<8x32xbf16>
    tpu.vector_store %arg12[%99, %c0_37], %98 {strides = array<i32>} : memref<64x32xbf16, #tpu.memory_space<vmem>>, vector<8x32xbf16>,
    %c3_i32 = arith.constant 3 : i32
    %c8_i32_38 = arith.constant 8 : i32
    %101 = arith.muli %c3_i32, %c8_i32_38 : i32
    %102 = tpu.assume_multiple %101, 8 : i32
    %103 = arith.index_cast %102 : i32 to index
    %c0_39 = arith.constant 0 : index
    %104 = vector.load %arg13[%103, %c0_39] : memref<64x128xf32, #tpu.memory_space<vmem>>, vector<8x128xf32>
    %105 = arith.truncf %97 : vector<8x32xf32> to vector<8x32xbf16>
    %cst_40 = arith.constant dense<0.000000e+00> : vector<8x128xf32>
    %106 = tpu.matmul %105, %4, %cst_40 {dimension_numbers = #tpu.dot_dimension_numbers<[1], [0], [0], [1], [0, 0, 1, 1], [], []>} : vector<8x32xbf16>, vector<32x128xbf16>, vector<8x128xf32> -> vector<8x128xf32>
    %107 = arith.addf %104, %106 : vector<8x128xf32>
    %108 = vector.extract_strided_slice %107 {offsets = [0, 0], sizes = [8, 96], strides = [1, 1]} : vector<8x128xf32> to vector<8x96xf32>
    %cst_41 = arith.constant 5.000000e-01 : f32
    %109 = vector.broadcast %cst_41 : f32 to vector<8x96xf32>
    %110 = arith.mulf %109, %108 : vector<8x96xf32>
    %111 = math.tanh %110 : vector<8x96xf32>
    %cst_42 = arith.constant 5.000000e-01 : f32
    %112 = vector.broadcast %cst_42 : f32 to vector<8x96xf32>
    %113 = arith.mulf %112, %111 : vector<8x96xf32>
    %cst_43 = arith.constant 5.000000e-01 : f32
    %114 = vector.broadcast %cst_43 : f32 to vector<8x96xf32>
    %115 = arith.addf %113, %114 : vector<8x96xf32>
    %116 = vector.extract_strided_slice %115 {offsets = [0, 0], sizes = [8, 32], strides = [1, 1]} : vector<8x96xf32> to vector<8x32xf32>
    %117 = vector.extract_strided_slice %115 {offsets = [0, 32], sizes = [8, 32], strides = [1, 1]} : vector<8x96xf32> to vector<8x32xf32>
    %118 = vector.extract_strided_slice %115 {offsets = [0, 64], sizes = [8, 32], strides = [1, 1]} : vector<8x96xf32> to vector<8x32xf32>
    %119 = vector.extract_strided_slice %107 {offsets = [0, 96], sizes = [8, 32], strides = [1, 1]} : vector<8x128xf32> to vector<8x32xf32>
    %120 = math.tanh %119 : vector<8x32xf32>
    %121 = arith.mulf %117, %95 : vector<8x32xf32>
    %122 = arith.mulf %116, %120 : vector<8x32xf32>
    %123 = arith.addf %121, %122 : vector<8x32xf32>
    %124 = math.tanh %123 : vector<8x32xf32>
    %125 = arith.mulf %118, %124 : vector<8x32xf32>
    %126 = arith.truncf %125 : vector<8x32xf32> to vector<8x32xbf16>
    %127 = arith.index_cast %102 : i32 to index
    %c0_44 = arith.constant 0 : index
    %128 = vector.load %arg12[%127, %c0_44] : memref<64x32xbf16, #tpu.memory_space<vmem>>, vector<8x32xbf16>
    tpu.vector_store %arg12[%127, %c0_44], %126 {strides = array<i32>} : memref<64x32xbf16, #tpu.memory_space<vmem>>, vector<8x32xbf16>,
    %c4_i32 = arith.constant 4 : i32
    %c8_i32_45 = arith.constant 8 : i32
    %129 = arith.muli %c4_i32, %c8_i32_45 : i32
    %130 = tpu.assume_multiple %129, 8 : i32
    %131 = arith.index_cast %130 : i32 to index
    %c0_46 = arith.constant 0 : index
    %132 = vector.load %arg13[%131, %c0_46] : memref<64x128xf32, #tpu.memory_space<vmem>>, vector<8x128xf32>
    %133 = arith.truncf %125 : vector<8x32xf32> to vector<8x32xbf16>
    %cst_47 = arith.constant dense<0.000000e+00> : vector<8x128xf32>
    %134 = tpu.matmul %133, %4, %cst_47 {dimension_numbers = #tpu.dot_dimension_numbers<[1], [0], [0], [1], [0, 0, 1, 1], [], []>} : vector<8x32xbf16>, vector<32x128xbf16>, vector<8x128xf32> -> vector<8x128xf32>
    %135 = arith.addf %132, %134 : vector<8x128xf32>
    %136 = vector.extract_strided_slice %135 {offsets = [0, 0], sizes = [8, 96], strides = [1, 1]} : vector<8x128xf32> to vector<8x96xf32>
    %cst_48 = arith.constant 5.000000e-01 : f32
    %137 = vector.broadcast %cst_48 : f32 to vector<8x96xf32>
    %138 = arith.mulf %137, %136 : vector<8x96xf32>
    %139 = math.tanh %138 : vector<8x96xf32>
    %cst_49 = arith.constant 5.000000e-01 : f32
    %140 = vector.broadcast %cst_49 : f32 to vector<8x96xf32>
    %141 = arith.mulf %140, %139 : vector<8x96xf32>
    %cst_50 = arith.constant 5.000000e-01 : f32
    %142 = vector.broadcast %cst_50 : f32 to vector<8x96xf32>
    %143 = arith.addf %141, %142 : vector<8x96xf32>
    %144 = vector.extract_strided_slice %143 {offsets = [0, 0], sizes = [8, 32], strides = [1, 1]} : vector<8x96xf32> to vector<8x32xf32>
    %145 = vector.extract_strided_slice %143 {offsets = [0, 32], sizes = [8, 32], strides = [1, 1]} : vector<8x96xf32> to vector<8x32xf32>
    %146 = vector.extract_strided_slice %143 {offsets = [0, 64], sizes = [8, 32], strides = [1, 1]} : vector<8x96xf32> to vector<8x32xf32>
    %147 = vector.extract_strided_slice %135 {offsets = [0, 96], sizes = [8, 32], strides = [1, 1]} : vector<8x128xf32> to vector<8x32xf32>
    %148 = math.tanh %147 : vector<8x32xf32>
    %149 = arith.mulf %145, %123 : vector<8x32xf32>
    %150 = arith.mulf %144, %148 : vector<8x32xf32>
    %151 = arith.addf %149, %150 : vector<8x32xf32>
    %152 = math.tanh %151 : vector<8x32xf32>
    %153 = arith.mulf %146, %152 : vector<8x32xf32>
    %154 = arith.truncf %153 : vector<8x32xf32> to vector<8x32xbf16>
    %155 = arith.index_cast %130 : i32 to index
    %c0_51 = arith.constant 0 : index
    %156 = vector.load %arg12[%155, %c0_51] : memref<64x32xbf16, #tpu.memory_space<vmem>>, vector<8x32xbf16>
    tpu.vector_store %arg12[%155, %c0_51], %154 {strides = array<i32>} : memref<64x32xbf16, #tpu.memory_space<vmem>>, vector<8x32xbf16>,
    %c5_i32 = arith.constant 5 : i32
    %c8_i32_52 = arith.constant 8 : i32
    %157 = arith.muli %c5_i32, %c8_i32_52 : i32
    %158 = tpu.assume_multiple %157, 8 : i32
    %159 = arith.index_cast %158 : i32 to index
    %c0_53 = arith.constant 0 : index
    %160 = vector.load %arg13[%159, %c0_53] : memref<64x128xf32, #tpu.memory_space<vmem>>, vector<8x128xf32>
    %161 = arith.truncf %153 : vector<8x32xf32> to vector<8x32xbf16>
    %cst_54 = arith.constant dense<0.000000e+00> : vector<8x128xf32>
    %162 = tpu.matmul %161, %4, %cst_54 {dimension_numbers = #tpu.dot_dimension_numbers<[1], [0], [0], [1], [0, 0, 1, 1], [], []>} : vector<8x32xbf16>, vector<32x128xbf16>, vector<8x128xf32> -> vector<8x128xf32>
    %163 = arith.addf %160, %162 : vector<8x128xf32>
    %164 = vector.extract_strided_slice %163 {offsets = [0, 0], sizes = [8, 96], strides = [1, 1]} : vector<8x128xf32> to vector<8x96xf32>
    %cst_55 = arith.constant 5.000000e-01 : f32
    %165 = vector.broadcast %cst_55 : f32 to vector<8x96xf32>
    %166 = arith.mulf %165, %164 : vector<8x96xf32>
    %167 = math.tanh %166 : vector<8x96xf32>
    %cst_56 = arith.constant 5.000000e-01 : f32
    %168 = vector.broadcast %cst_56 : f32 to vector<8x96xf32>
    %169 = arith.mulf %168, %167 : vector<8x96xf32>
    %cst_57 = arith.constant 5.000000e-01 : f32
    %170 = vector.broadcast %cst_57 : f32 to vector<8x96xf32>
    %171 = arith.addf %169, %170 : vector<8x96xf32>
    %172 = vector.extract_strided_slice %171 {offsets = [0, 0], sizes = [8, 32], strides = [1, 1]} : vector<8x96xf32> to vector<8x32xf32>
    %173 = vector.extract_strided_slice %171 {offsets = [0, 32], sizes = [8, 32], strides = [1, 1]} : vector<8x96xf32> to vector<8x32xf32>
    %174 = vector.extract_strided_slice %171 {offsets = [0, 64], sizes = [8, 32], strides = [1, 1]} : vector<8x96xf32> to vector<8x32xf32>
    %175 = vector.extract_strided_slice %163 {offsets = [0, 96], sizes = [8, 32], strides = [1, 1]} : vector<8x128xf32> to vector<8x32xf32>
    %176 = math.tanh %175 : vector<8x32xf32>
    %177 = arith.mulf %173, %151 : vector<8x32xf32>
    %178 = arith.mulf %172, %176 : vector<8x32xf32>
    %179 = arith.addf %177, %178 : vector<8x32xf32>
    %180 = math.tanh %179 : vector<8x32xf32>
    %181 = arith.mulf %174, %180 : vector<8x32xf32>
    %182 = arith.truncf %181 : vector<8x32xf32> to vector<8x32xbf16>
    %183 = arith.index_cast %158 : i32 to index
    %c0_58 = arith.constant 0 : index
    %184 = vector.load %arg12[%183, %c0_58] : memref<64x32xbf16, #tpu.memory_space<vmem>>, vector<8x32xbf16>
    tpu.vector_store %arg12[%183, %c0_58], %182 {strides = array<i32>} : memref<64x32xbf16, #tpu.memory_space<vmem>>, vector<8x32xbf16>,
    %c6_i32 = arith.constant 6 : i32
    %c8_i32_59 = arith.constant 8 : i32
    %185 = arith.muli %c6_i32, %c8_i32_59 : i32
    %186 = tpu.assume_multiple %185, 8 : i32
    %187 = arith.index_cast %186 : i32 to index
    %c0_60 = arith.constant 0 : index
    %188 = vector.load %arg13[%187, %c0_60] : memref<64x128xf32, #tpu.memory_space<vmem>>, vector<8x128xf32>
    %189 = arith.truncf %181 : vector<8x32xf32> to vector<8x32xbf16>
    %cst_61 = arith.constant dense<0.000000e+00> : vector<8x128xf32>
    %190 = tpu.matmul %189, %4, %cst_61 {dimension_numbers = #tpu.dot_dimension_numbers<[1], [0], [0], [1], [0, 0, 1, 1], [], []>} : vector<8x32xbf16>, vector<32x128xbf16>, vector<8x128xf32> -> vector<8x128xf32>
    %191 = arith.addf %188, %190 : vector<8x128xf32>
    %192 = vector.extract_strided_slice %191 {offsets = [0, 0], sizes = [8, 96], strides = [1, 1]} : vector<8x128xf32> to vector<8x96xf32>
    %cst_62 = arith.constant 5.000000e-01 : f32
    %193 = vector.broadcast %cst_62 : f32 to vector<8x96xf32>
    %194 = arith.mulf %193, %192 : vector<8x96xf32>
    %195 = math.tanh %194 : vector<8x96xf32>
    %cst_63 = arith.constant 5.000000e-01 : f32
    %196 = vector.broadcast %cst_63 : f32 to vector<8x96xf32>
    %197 = arith.mulf %196, %195 : vector<8x96xf32>
    %cst_64 = arith.constant 5.000000e-01 : f32
    %198 = vector.broadcast %cst_64 : f32 to vector<8x96xf32>
    %199 = arith.addf %197, %198 : vector<8x96xf32>
    %200 = vector.extract_strided_slice %199 {offsets = [0, 0], sizes = [8, 32], strides = [1, 1]} : vector<8x96xf32> to vector<8x32xf32>
    %201 = vector.extract_strided_slice %199 {offsets = [0, 32], sizes = [8, 32], strides = [1, 1]} : vector<8x96xf32> to vector<8x32xf32>
    %202 = vector.extract_strided_slice %199 {offsets = [0, 64], sizes = [8, 32], strides = [1, 1]} : vector<8x96xf32> to vector<8x32xf32>
    %203 = vector.extract_strided_slice %191 {offsets = [0, 96], sizes = [8, 32], strides = [1, 1]} : vector<8x128xf32> to vector<8x32xf32>
    %204 = math.tanh %203 : vector<8x32xf32>
    %205 = arith.mulf %201, %179 : vector<8x32xf32>
    %206 = arith.mulf %200, %204 : vector<8x32xf32>
    %207 = arith.addf %205, %206 : vector<8x32xf32>
    %208 = math.tanh %207 : vector<8x32xf32>
    %209 = arith.mulf %202, %208 : vector<8x32xf32>
    %210 = arith.truncf %209 : vector<8x32xf32> to vector<8x32xbf16>
    %211 = arith.index_cast %186 : i32 to index
    %c0_65 = arith.constant 0 : index
    %212 = vector.load %arg12[%211, %c0_65] : memref<64x32xbf16, #tpu.memory_space<vmem>>, vector<8x32xbf16>
    tpu.vector_store %arg12[%211, %c0_65], %210 {strides = array<i32>} : memref<64x32xbf16, #tpu.memory_space<vmem>>, vector<8x32xbf16>,
    %c7_i32 = arith.constant 7 : i32
    %c8_i32_66 = arith.constant 8 : i32
    %213 = arith.muli %c7_i32, %c8_i32_66 : i32
    %214 = tpu.assume_multiple %213, 8 : i32
    %215 = arith.index_cast %214 : i32 to index
    %c0_67 = arith.constant 0 : index
    %216 = vector.load %arg13[%215, %c0_67] : memref<64x128xf32, #tpu.memory_space<vmem>>, vector<8x128xf32>
    %217 = arith.truncf %209 : vector<8x32xf32> to vector<8x32xbf16>
    %cst_68 = arith.constant dense<0.000000e+00> : vector<8x128xf32>
    %218 = tpu.matmul %217, %4, %cst_68 {dimension_numbers = #tpu.dot_dimension_numbers<[1], [0], [0], [1], [0, 0, 1, 1], [], []>} : vector<8x32xbf16>, vector<32x128xbf16>, vector<8x128xf32> -> vector<8x128xf32>
    %219 = arith.addf %216, %218 : vector<8x128xf32>
    %220 = vector.extract_strided_slice %219 {offsets = [0, 0], sizes = [8, 96], strides = [1, 1]} : vector<8x128xf32> to vector<8x96xf32>
    %cst_69 = arith.constant 5.000000e-01 : f32
    %221 = vector.broadcast %cst_69 : f32 to vector<8x96xf32>
    %222 = arith.mulf %221, %220 : vector<8x96xf32>
    %223 = math.tanh %222 : vector<8x96xf32>
    %cst_70 = arith.constant 5.000000e-01 : f32
    %224 = vector.broadcast %cst_70 : f32 to vector<8x96xf32>
    %225 = arith.mulf %224, %223 : vector<8x96xf32>
    %cst_71 = arith.constant 5.000000e-01 : f32
    %226 = vector.broadcast %cst_71 : f32 to vector<8x96xf32>
    %227 = arith.addf %225, %226 : vector<8x96xf32>
    %228 = vector.extract_strided_slice %227 {offsets = [0, 0], sizes = [8, 32], strides = [1, 1]} : vector<8x96xf32> to vector<8x32xf32>
    %229 = vector.extract_strided_slice %227 {offsets = [0, 32], sizes = [8, 32], strides = [1, 1]} : vector<8x96xf32> to vector<8x32xf32>
    %230 = vector.extract_strided_slice %227 {offsets = [0, 64], sizes = [8, 32], strides = [1, 1]} : vector<8x96xf32> to vector<8x32xf32>
    %231 = vector.extract_strided_slice %219 {offsets = [0, 96], sizes = [8, 32], strides = [1, 1]} : vector<8x128xf32> to vector<8x32xf32>
    %232 = math.tanh %231 : vector<8x32xf32>
    %233 = arith.mulf %229, %207 : vector<8x32xf32>
    %234 = arith.mulf %228, %232 : vector<8x32xf32>
    %235 = arith.addf %233, %234 : vector<8x32xf32>
    %236 = math.tanh %235 : vector<8x32xf32>
    %237 = arith.mulf %230, %236 : vector<8x32xf32>
    %238 = arith.truncf %237 : vector<8x32xf32> to vector<8x32xbf16>
    %239 = arith.index_cast %214 : i32 to index
    %c0_72 = arith.constant 0 : index
    %240 = vector.load %arg12[%239, %c0_72] : memref<64x32xbf16, #tpu.memory_space<vmem>>, vector<8x32xbf16>
    tpu.vector_store %arg12[%239, %c0_72], %238 {strides = array<i32>} : memref<64x32xbf16, #tpu.memory_space<vmem>>, vector<8x32xbf16>,
    %c8_i32_73 = arith.constant 8 : i32
    %c0_74 = arith.constant 0 : index
    %c0_75 = arith.constant 0 : index
    %c0_76 = arith.constant 0 : index
    %241 = vector.load %arg10[%c0_74, %c0_75, %c0_76] : memref<2x8x32xf32, #tpu.memory_space<vmem>>, vector<1x8x32xf32>
    %242 = vector.shape_cast %241 : vector<1x8x32xf32> to vector<8x32xf32>
    %243 = vector.shape_cast %237 : vector<8x32xf32> to vector<1x8x32xf32>
    tpu.vector_store %arg10[%c0_74, %c0_75, %c0_76], %243 {strides = array<i32>} : memref<2x8x32xf32, #tpu.memory_space<vmem>>, vector<1x8x32xf32>,
    %c0_77 = arith.constant 0 : index
    %c0_78 = arith.constant 0 : index
    %c0_79 = arith.constant 0 : index
    %244 = vector.load %arg11[%c0_77, %c0_78, %c0_79] : memref<2x8x32xf32, #tpu.memory_space<vmem>>, vector<1x8x32xf32>
    %245 = vector.shape_cast %244 : vector<1x8x32xf32> to vector<8x32xf32>
    %246 = vector.shape_cast %235 : vector<8x32xf32> to vector<1x8x32xf32>
    tpu.vector_store %arg11[%c0_77, %c0_78, %c0_79], %246 {strides = array<i32>} : memref<2x8x32xf32, #tpu.memory_space<vmem>>, vector<1x8x32xf32>,
    %c0_80 = arith.constant 0 : index
    %c0_81 = arith.constant 0 : index
    %247 = vector.load %arg6[%c0_80, %c0_81] : memref<32x128xbf16, #tpu.memory_space<vmem>>, vector<32x128xbf16>
    %c0_82 = arith.constant 0 : index
    %c0_83 = arith.constant 0 : index
    %248 = vector.load %arg7[%c0_82, %c0_83] : memref<32x128xbf16, #tpu.memory_space<vmem>>, vector<32x128xbf16>
    %c0_84 = arith.constant 0 : index
    %c0_85 = arith.constant 0 : index
    %249 = vector.load %arg8[%c0_84, %c0_85] : memref<1x128xf32, #tpu.memory_space<vmem>>, vector<1x128xf32>
    %c0_86 = arith.constant 0 : index
    %c0_87 = arith.constant 0 : index
    %250 = vector.load %arg12[%c0_86, %c0_87] : memref<64x32xbf16, #tpu.memory_space<vmem>>, vector<64x32xbf16>
    %cst_88 = arith.constant dense<0.000000e+00> : vector<64x128xf32>
    %251 = tpu.matmul %250, %247, %cst_88 {dimension_numbers = #tpu.dot_dimension_numbers<[1], [0], [0], [1], [0, 0, 1, 1], [], []>} : vector<64x32xbf16>, vector<32x128xbf16>, vector<64x128xf32> -> vector<64x128xf32>
    %252 = vector.broadcast %249 : vector<1x128xf32> to vector<64x128xf32>
    %253 = arith.addf %251, %252 : vector<64x128xf32>
    %c0_89 = arith.constant 0 : index
    %c0_90 = arith.constant 0 : index
    %254 = vector.load %arg13[%c0_89, %c0_90] : memref<64x128xf32, #tpu.memory_space<vmem>>, vector<64x128xf32>
    tpu.vector_store %arg13[%c0_89, %c0_90], %253 {strides = array<i32>} : memref<64x128xf32, #tpu.memory_space<vmem>>, vector<64x128xf32>,
    %c1 = arith.constant 1 : index
    %c0_91 = arith.constant 0 : index
    %c0_92 = arith.constant 0 : index
    %255 = vector.load %arg10[%c1, %c0_91, %c0_92] : memref<2x8x32xf32, #tpu.memory_space<vmem>>, vector<1x8x32xf32>
    %256 = vector.shape_cast %255 : vector<1x8x32xf32> to vector<8x32xf32>
    %c1_93 = arith.constant 1 : index
    %c0_94 = arith.constant 0 : index
    %c0_95 = arith.constant 0 : index
    %257 = vector.load %arg11[%c1_93, %c0_94, %c0_95] : memref<2x8x32xf32, #tpu.memory_space<vmem>>, vector<1x8x32xf32>
    %258 = vector.shape_cast %257 : vector<1x8x32xf32> to vector<8x32xf32>
    %c0_i32_96 = arith.constant 0 : i32
    %c8_i32_97 = arith.constant 8 : i32
    %259 = arith.muli %c0_i32_96, %c8_i32_97 : i32
    %260 = tpu.assume_multiple %259, 8 : i32
    %261 = arith.index_cast %260 : i32 to index
    %c0_98 = arith.constant 0 : index
    %262 = vector.load %arg13[%261, %c0_98] : memref<64x128xf32, #tpu.memory_space<vmem>>, vector<8x128xf32>
    %263 = arith.truncf %256 : vector<8x32xf32> to vector<8x32xbf16>
    %cst_99 = arith.constant dense<0.000000e+00> : vector<8x128xf32>
    %264 = tpu.matmul %263, %248, %cst_99 {dimension_numbers = #tpu.dot_dimension_numbers<[1], [0], [0], [1], [0, 0, 1, 1], [], []>} : vector<8x32xbf16>, vector<32x128xbf16>, vector<8x128xf32> -> vector<8x128xf32>
    %265 = arith.addf %262, %264 : vector<8x128xf32>
    %266 = vector.extract_strided_slice %265 {offsets = [0, 0], sizes = [8, 96], strides = [1, 1]} : vector<8x128xf32> to vector<8x96xf32>
    %cst_100 = arith.constant 5.000000e-01 : f32
    %267 = vector.broadcast %cst_100 : f32 to vector<8x96xf32>
    %268 = arith.mulf %267, %266 : vector<8x96xf32>
    %269 = math.tanh %268 : vector<8x96xf32>
    %cst_101 = arith.constant 5.000000e-01 : f32
    %270 = vector.broadcast %cst_101 : f32 to vector<8x96xf32>
    %271 = arith.mulf %270, %269 : vector<8x96xf32>
    %cst_102 = arith.constant 5.000000e-01 : f32
    %272 = vector.broadcast %cst_102 : f32 to vector<8x96xf32>
    %273 = arith.addf %271, %272 : vector<8x96xf32>
    %274 = vector.extract_strided_slice %273 {offsets = [0, 0], sizes = [8, 32], strides = [1, 1]} : vector<8x96xf32> to vector<8x32xf32>
    %275 = vector.extract_strided_slice %273 {offsets = [0, 32], sizes = [8, 32], strides = [1, 1]} : vector<8x96xf32> to vector<8x32xf32>
    %276 = vector.extract_strided_slice %273 {offsets = [0, 64], sizes = [8, 32], strides = [1, 1]} : vector<8x96xf32> to vector<8x32xf32>
    %277 = vector.extract_strided_slice %265 {offsets = [0, 96], sizes = [8, 32], strides = [1, 1]} : vector<8x128xf32> to vector<8x32xf32>
    %278 = math.tanh %277 : vector<8x32xf32>
    %279 = arith.mulf %275, %258 : vector<8x32xf32>
    %280 = arith.mulf %274, %278 : vector<8x32xf32>
    %281 = arith.addf %279, %280 : vector<8x32xf32>
    %282 = math.tanh %281 : vector<8x32xf32>
    %283 = arith.mulf %276, %282 : vector<8x32xf32>
    %c1_i32_103 = arith.constant 1 : i32
    %c8_i32_104 = arith.constant 8 : i32
    %284 = arith.muli %c1_i32_103, %c8_i32_104 : i32
    %285 = tpu.assume_multiple %284, 8 : i32
    %286 = arith.index_cast %285 : i32 to index
    %c0_105 = arith.constant 0 : index
    %287 = vector.load %arg13[%286, %c0_105] : memref<64x128xf32, #tpu.memory_space<vmem>>, vector<8x128xf32>
    %288 = arith.truncf %283 : vector<8x32xf32> to vector<8x32xbf16>
    %cst_106 = arith.constant dense<0.000000e+00> : vector<8x128xf32>
    %289 = tpu.matmul %288, %248, %cst_106 {dimension_numbers = #tpu.dot_dimension_numbers<[1], [0], [0], [1], [0, 0, 1, 1], [], []>} : vector<8x32xbf16>, vector<32x128xbf16>, vector<8x128xf32> -> vector<8x128xf32>
    %290 = arith.addf %287, %289 : vector<8x128xf32>
    %291 = vector.extract_strided_slice %290 {offsets = [0, 0], sizes = [8, 96], strides = [1, 1]} : vector<8x128xf32> to vector<8x96xf32>
    %cst_107 = arith.constant 5.000000e-01 : f32
    %292 = vector.broadcast %cst_107 : f32 to vector<8x96xf32>
    %293 = arith.mulf %292, %291 : vector<8x96xf32>
    %294 = math.tanh %293 : vector<8x96xf32>
    %cst_108 = arith.constant 5.000000e-01 : f32
    %295 = vector.broadcast %cst_108 : f32 to vector<8x96xf32>
    %296 = arith.mulf %295, %294 : vector<8x96xf32>
    %cst_109 = arith.constant 5.000000e-01 : f32
    %297 = vector.broadcast %cst_109 : f32 to vector<8x96xf32>
    %298 = arith.addf %296, %297 : vector<8x96xf32>
    %299 = vector.extract_strided_slice %298 {offsets = [0, 0], sizes = [8, 32], strides = [1, 1]} : vector<8x96xf32> to vector<8x32xf32>
    %300 = vector.extract_strided_slice %298 {offsets = [0, 32], sizes = [8, 32], strides = [1, 1]} : vector<8x96xf32> to vector<8x32xf32>
    %301 = vector.extract_strided_slice %298 {offsets = [0, 64], sizes = [8, 32], strides = [1, 1]} : vector<8x96xf32> to vector<8x32xf32>
    %302 = vector.extract_strided_slice %290 {offsets = [0, 96], sizes = [8, 32], strides = [1, 1]} : vector<8x128xf32> to vector<8x32xf32>
    %303 = math.tanh %302 : vector<8x32xf32>
    %304 = arith.mulf %300, %281 : vector<8x32xf32>
    %305 = arith.mulf %299, %303 : vector<8x32xf32>
    %306 = arith.addf %304, %305 : vector<8x32xf32>
    %307 = math.tanh %306 : vector<8x32xf32>
    %308 = arith.mulf %301, %307 : vector<8x32xf32>
    %c2_i32_110 = arith.constant 2 : i32
    %c8_i32_111 = arith.constant 8 : i32
    %309 = arith.muli %c2_i32_110, %c8_i32_111 : i32
    %310 = tpu.assume_multiple %309, 8 : i32
    %311 = arith.index_cast %310 : i32 to index
    %c0_112 = arith.constant 0 : index
    %312 = vector.load %arg13[%311, %c0_112] : memref<64x128xf32, #tpu.memory_space<vmem>>, vector<8x128xf32>
    %313 = arith.truncf %308 : vector<8x32xf32> to vector<8x32xbf16>
    %cst_113 = arith.constant dense<0.000000e+00> : vector<8x128xf32>
    %314 = tpu.matmul %313, %248, %cst_113 {dimension_numbers = #tpu.dot_dimension_numbers<[1], [0], [0], [1], [0, 0, 1, 1], [], []>} : vector<8x32xbf16>, vector<32x128xbf16>, vector<8x128xf32> -> vector<8x128xf32>
    %315 = arith.addf %312, %314 : vector<8x128xf32>
    %316 = vector.extract_strided_slice %315 {offsets = [0, 0], sizes = [8, 96], strides = [1, 1]} : vector<8x128xf32> to vector<8x96xf32>
    %cst_114 = arith.constant 5.000000e-01 : f32
    %317 = vector.broadcast %cst_114 : f32 to vector<8x96xf32>
    %318 = arith.mulf %317, %316 : vector<8x96xf32>
    %319 = math.tanh %318 : vector<8x96xf32>
    %cst_115 = arith.constant 5.000000e-01 : f32
    %320 = vector.broadcast %cst_115 : f32 to vector<8x96xf32>
    %321 = arith.mulf %320, %319 : vector<8x96xf32>
    %cst_116 = arith.constant 5.000000e-01 : f32
    %322 = vector.broadcast %cst_116 : f32 to vector<8x96xf32>
    %323 = arith.addf %321, %322 : vector<8x96xf32>
    %324 = vector.extract_strided_slice %323 {offsets = [0, 0], sizes = [8, 32], strides = [1, 1]} : vector<8x96xf32> to vector<8x32xf32>
    %325 = vector.extract_strided_slice %323 {offsets = [0, 32], sizes = [8, 32], strides = [1, 1]} : vector<8x96xf32> to vector<8x32xf32>
    %326 = vector.extract_strided_slice %323 {offsets = [0, 64], sizes = [8, 32], strides = [1, 1]} : vector<8x96xf32> to vector<8x32xf32>
    %327 = vector.extract_strided_slice %315 {offsets = [0, 96], sizes = [8, 32], strides = [1, 1]} : vector<8x128xf32> to vector<8x32xf32>
    %328 = math.tanh %327 : vector<8x32xf32>
    %329 = arith.mulf %325, %306 : vector<8x32xf32>
    %330 = arith.mulf %324, %328 : vector<8x32xf32>
    %331 = arith.addf %329, %330 : vector<8x32xf32>
    %332 = math.tanh %331 : vector<8x32xf32>
    %333 = arith.mulf %326, %332 : vector<8x32xf32>
    %c3_i32_117 = arith.constant 3 : i32
    %c8_i32_118 = arith.constant 8 : i32
    %334 = arith.muli %c3_i32_117, %c8_i32_118 : i32
    %335 = tpu.assume_multiple %334, 8 : i32
    %336 = arith.index_cast %335 : i32 to index
    %c0_119 = arith.constant 0 : index
    %337 = vector.load %arg13[%336, %c0_119] : memref<64x128xf32, #tpu.memory_space<vmem>>, vector<8x128xf32>
    %338 = arith.truncf %333 : vector<8x32xf32> to vector<8x32xbf16>
    %cst_120 = arith.constant dense<0.000000e+00> : vector<8x128xf32>
    %339 = tpu.matmul %338, %248, %cst_120 {dimension_numbers = #tpu.dot_dimension_numbers<[1], [0], [0], [1], [0, 0, 1, 1], [], []>} : vector<8x32xbf16>, vector<32x128xbf16>, vector<8x128xf32> -> vector<8x128xf32>
    %340 = arith.addf %337, %339 : vector<8x128xf32>
    %341 = vector.extract_strided_slice %340 {offsets = [0, 0], sizes = [8, 96], strides = [1, 1]} : vector<8x128xf32> to vector<8x96xf32>
    %cst_121 = arith.constant 5.000000e-01 : f32
    %342 = vector.broadcast %cst_121 : f32 to vector<8x96xf32>
    %343 = arith.mulf %342, %341 : vector<8x96xf32>
    %344 = math.tanh %343 : vector<8x96xf32>
    %cst_122 = arith.constant 5.000000e-01 : f32
    %345 = vector.broadcast %cst_122 : f32 to vector<8x96xf32>
    %346 = arith.mulf %345, %344 : vector<8x96xf32>
    %cst_123 = arith.constant 5.000000e-01 : f32
    %347 = vector.broadcast %cst_123 : f32 to vector<8x96xf32>
    %348 = arith.addf %346, %347 : vector<8x96xf32>
    %349 = vector.extract_strided_slice %348 {offsets = [0, 0], sizes = [8, 32], strides = [1, 1]} : vector<8x96xf32> to vector<8x32xf32>
    %350 = vector.extract_strided_slice %348 {offsets = [0, 32], sizes = [8, 32], strides = [1, 1]} : vector<8x96xf32> to vector<8x32xf32>
    %351 = vector.extract_strided_slice %348 {offsets = [0, 64], sizes = [8, 32], strides = [1, 1]} : vector<8x96xf32> to vector<8x32xf32>
    %352 = vector.extract_strided_slice %340 {offsets = [0, 96], sizes = [8, 32], strides = [1, 1]} : vector<8x128xf32> to vector<8x32xf32>
    %353 = math.tanh %352 : vector<8x32xf32>
    %354 = arith.mulf %350, %331 : vector<8x32xf32>
    %355 = arith.mulf %349, %353 : vector<8x32xf32>
    %356 = arith.addf %354, %355 : vector<8x32xf32>
    %357 = math.tanh %356 : vector<8x32xf32>
    %358 = arith.mulf %351, %357 : vector<8x32xf32>
    %c4_i32_124 = arith.constant 4 : i32
    %c8_i32_125 = arith.constant 8 : i32
    %359 = arith.muli %c4_i32_124, %c8_i32_125 : i32
    %360 = tpu.assume_multiple %359, 8 : i32
    %361 = arith.index_cast %360 : i32 to index
    %c0_126 = arith.constant 0 : index
    %362 = vector.load %arg13[%361, %c0_126] : memref<64x128xf32, #tpu.memory_space<vmem>>, vector<8x128xf32>
    %363 = arith.truncf %358 : vector<8x32xf32> to vector<8x32xbf16>
    %cst_127 = arith.constant dense<0.000000e+00> : vector<8x128xf32>
    %364 = tpu.matmul %363, %248, %cst_127 {dimension_numbers = #tpu.dot_dimension_numbers<[1], [0], [0], [1], [0, 0, 1, 1], [], []>} : vector<8x32xbf16>, vector<32x128xbf16>, vector<8x128xf32> -> vector<8x128xf32>
    %365 = arith.addf %362, %364 : vector<8x128xf32>
    %366 = vector.extract_strided_slice %365 {offsets = [0, 0], sizes = [8, 96], strides = [1, 1]} : vector<8x128xf32> to vector<8x96xf32>
    %cst_128 = arith.constant 5.000000e-01 : f32
    %367 = vector.broadcast %cst_128 : f32 to vector<8x96xf32>
    %368 = arith.mulf %367, %366 : vector<8x96xf32>
    %369 = math.tanh %368 : vector<8x96xf32>
    %cst_129 = arith.constant 5.000000e-01 : f32
    %370 = vector.broadcast %cst_129 : f32 to vector<8x96xf32>
    %371 = arith.mulf %370, %369 : vector<8x96xf32>
    %cst_130 = arith.constant 5.000000e-01 : f32
    %372 = vector.broadcast %cst_130 : f32 to vector<8x96xf32>
    %373 = arith.addf %371, %372 : vector<8x96xf32>
    %374 = vector.extract_strided_slice %373 {offsets = [0, 0], sizes = [8, 32], strides = [1, 1]} : vector<8x96xf32> to vector<8x32xf32>
    %375 = vector.extract_strided_slice %373 {offsets = [0, 32], sizes = [8, 32], strides = [1, 1]} : vector<8x96xf32> to vector<8x32xf32>
    %376 = vector.extract_strided_slice %373 {offsets = [0, 64], sizes = [8, 32], strides = [1, 1]} : vector<8x96xf32> to vector<8x32xf32>
    %377 = vector.extract_strided_slice %365 {offsets = [0, 96], sizes = [8, 32], strides = [1, 1]} : vector<8x128xf32> to vector<8x32xf32>
    %378 = math.tanh %377 : vector<8x32xf32>
    %379 = arith.mulf %375, %356 : vector<8x32xf32>
    %380 = arith.mulf %374, %378 : vector<8x32xf32>
    %381 = arith.addf %379, %380 : vector<8x32xf32>
    %382 = math.tanh %381 : vector<8x32xf32>
    %383 = arith.mulf %376, %382 : vector<8x32xf32>
    %c5_i32_131 = arith.constant 5 : i32
    %c8_i32_132 = arith.constant 8 : i32
    %384 = arith.muli %c5_i32_131, %c8_i32_132 : i32
    %385 = tpu.assume_multiple %384, 8 : i32
    %386 = arith.index_cast %385 : i32 to index
    %c0_133 = arith.constant 0 : index
    %387 = vector.load %arg13[%386, %c0_133] : memref<64x128xf32, #tpu.memory_space<vmem>>, vector<8x128xf32>
    %388 = arith.truncf %383 : vector<8x32xf32> to vector<8x32xbf16>
    %cst_134 = arith.constant dense<0.000000e+00> : vector<8x128xf32>
    %389 = tpu.matmul %388, %248, %cst_134 {dimension_numbers = #tpu.dot_dimension_numbers<[1], [0], [0], [1], [0, 0, 1, 1], [], []>} : vector<8x32xbf16>, vector<32x128xbf16>, vector<8x128xf32> -> vector<8x128xf32>
    %390 = arith.addf %387, %389 : vector<8x128xf32>
    %391 = vector.extract_strided_slice %390 {offsets = [0, 0], sizes = [8, 96], strides = [1, 1]} : vector<8x128xf32> to vector<8x96xf32>
    %cst_135 = arith.constant 5.000000e-01 : f32
    %392 = vector.broadcast %cst_135 : f32 to vector<8x96xf32>
    %393 = arith.mulf %392, %391 : vector<8x96xf32>
    %394 = math.tanh %393 : vector<8x96xf32>
    %cst_136 = arith.constant 5.000000e-01 : f32
    %395 = vector.broadcast %cst_136 : f32 to vector<8x96xf32>
    %396 = arith.mulf %395, %394 : vector<8x96xf32>
    %cst_137 = arith.constant 5.000000e-01 : f32
    %397 = vector.broadcast %cst_137 : f32 to vector<8x96xf32>
    %398 = arith.addf %396, %397 : vector<8x96xf32>
    %399 = vector.extract_strided_slice %398 {offsets = [0, 0], sizes = [8, 32], strides = [1, 1]} : vector<8x96xf32> to vector<8x32xf32>
    %400 = vector.extract_strided_slice %398 {offsets = [0, 32], sizes = [8, 32], strides = [1, 1]} : vector<8x96xf32> to vector<8x32xf32>
    %401 = vector.extract_strided_slice %398 {offsets = [0, 64], sizes = [8, 32], strides = [1, 1]} : vector<8x96xf32> to vector<8x32xf32>
    %402 = vector.extract_strided_slice %390 {offsets = [0, 96], sizes = [8, 32], strides = [1, 1]} : vector<8x128xf32> to vector<8x32xf32>
    %403 = math.tanh %402 : vector<8x32xf32>
    %404 = arith.mulf %400, %381 : vector<8x32xf32>
    %405 = arith.mulf %399, %403 : vector<8x32xf32>
    %406 = arith.addf %404, %405 : vector<8x32xf32>
    %407 = math.tanh %406 : vector<8x32xf32>
    %408 = arith.mulf %401, %407 : vector<8x32xf32>
    %c6_i32_138 = arith.constant 6 : i32
    %c8_i32_139 = arith.constant 8 : i32
    %409 = arith.muli %c6_i32_138, %c8_i32_139 : i32
    %410 = tpu.assume_multiple %409, 8 : i32
    %411 = arith.index_cast %410 : i32 to index
    %c0_140 = arith.constant 0 : index
    %412 = vector.load %arg13[%411, %c0_140] : memref<64x128xf32, #tpu.memory_space<vmem>>, vector<8x128xf32>
    %413 = arith.truncf %408 : vector<8x32xf32> to vector<8x32xbf16>
    %cst_141 = arith.constant dense<0.000000e+00> : vector<8x128xf32>
    %414 = tpu.matmul %413, %248, %cst_141 {dimension_numbers = #tpu.dot_dimension_numbers<[1], [0], [0], [1], [0, 0, 1, 1], [], []>} : vector<8x32xbf16>, vector<32x128xbf16>, vector<8x128xf32> -> vector<8x128xf32>
    %415 = arith.addf %412, %414 : vector<8x128xf32>
    %416 = vector.extract_strided_slice %415 {offsets = [0, 0], sizes = [8, 96], strides = [1, 1]} : vector<8x128xf32> to vector<8x96xf32>
    %cst_142 = arith.constant 5.000000e-01 : f32
    %417 = vector.broadcast %cst_142 : f32 to vector<8x96xf32>
    %418 = arith.mulf %417, %416 : vector<8x96xf32>
    %419 = math.tanh %418 : vector<8x96xf32>
    %cst_143 = arith.constant 5.000000e-01 : f32
    %420 = vector.broadcast %cst_143 : f32 to vector<8x96xf32>
    %421 = arith.mulf %420, %419 : vector<8x96xf32>
    %cst_144 = arith.constant 5.000000e-01 : f32
    %422 = vector.broadcast %cst_144 : f32 to vector<8x96xf32>
    %423 = arith.addf %421, %422 : vector<8x96xf32>
    %424 = vector.extract_strided_slice %423 {offsets = [0, 0], sizes = [8, 32], strides = [1, 1]} : vector<8x96xf32> to vector<8x32xf32>
    %425 = vector.extract_strided_slice %423 {offsets = [0, 32], sizes = [8, 32], strides = [1, 1]} : vector<8x96xf32> to vector<8x32xf32>
    %426 = vector.extract_strided_slice %423 {offsets = [0, 64], sizes = [8, 32], strides = [1, 1]} : vector<8x96xf32> to vector<8x32xf32>
    %427 = vector.extract_strided_slice %415 {offsets = [0, 96], sizes = [8, 32], strides = [1, 1]} : vector<8x128xf32> to vector<8x32xf32>
    %428 = math.tanh %427 : vector<8x32xf32>
    %429 = arith.mulf %425, %406 : vector<8x32xf32>
    %430 = arith.mulf %424, %428 : vector<8x32xf32>
    %431 = arith.addf %429, %430 : vector<8x32xf32>
    %432 = math.tanh %431 : vector<8x32xf32>
    %433 = arith.mulf %426, %432 : vector<8x32xf32>
    %c7_i32_145 = arith.constant 7 : i32
    %c8_i32_146 = arith.constant 8 : i32
    %434 = arith.muli %c7_i32_145, %c8_i32_146 : i32
    %435 = tpu.assume_multiple %434, 8 : i32
    %436 = arith.index_cast %435 : i32 to index
    %c0_147 = arith.constant 0 : index
    %437 = vector.load %arg13[%436, %c0_147] : memref<64x128xf32, #tpu.memory_space<vmem>>, vector<8x128xf32>
    %438 = arith.truncf %433 : vector<8x32xf32> to vector<8x32xbf16>
    %cst_148 = arith.constant dense<0.000000e+00> : vector<8x128xf32>
    %439 = tpu.matmul %438, %248, %cst_148 {dimension_numbers = #tpu.dot_dimension_numbers<[1], [0], [0], [1], [0, 0, 1, 1], [], []>} : vector<8x32xbf16>, vector<32x128xbf16>, vector<8x128xf32> -> vector<8x128xf32>
    %440 = arith.addf %437, %439 : vector<8x128xf32>
    %441 = vector.extract_strided_slice %440 {offsets = [0, 0], sizes = [8, 96], strides = [1, 1]} : vector<8x128xf32> to vector<8x96xf32>
    %cst_149 = arith.constant 5.000000e-01 : f32
    %442 = vector.broadcast %cst_149 : f32 to vector<8x96xf32>
    %443 = arith.mulf %442, %441 : vector<8x96xf32>
    %444 = math.tanh %443 : vector<8x96xf32>
    %cst_150 = arith.constant 5.000000e-01 : f32
    %445 = vector.broadcast %cst_150 : f32 to vector<8x96xf32>
    %446 = arith.mulf %445, %444 : vector<8x96xf32>
    %cst_151 = arith.constant 5.000000e-01 : f32
    %447 = vector.broadcast %cst_151 : f32 to vector<8x96xf32>
    %448 = arith.addf %446, %447 : vector<8x96xf32>
    %449 = vector.extract_strided_slice %448 {offsets = [0, 0], sizes = [8, 32], strides = [1, 1]} : vector<8x96xf32> to vector<8x32xf32>
    %450 = vector.extract_strided_slice %448 {offsets = [0, 32], sizes = [8, 32], strides = [1, 1]} : vector<8x96xf32> to vector<8x32xf32>
    %451 = vector.extract_strided_slice %448 {offsets = [0, 64], sizes = [8, 32], strides = [1, 1]} : vector<8x96xf32> to vector<8x32xf32>
    %452 = vector.extract_strided_slice %440 {offsets = [0, 96], sizes = [8, 32], strides = [1, 1]} : vector<8x128xf32> to vector<8x32xf32>
    %453 = math.tanh %452 : vector<8x32xf32>
    %454 = arith.mulf %450, %431 : vector<8x32xf32>
    %455 = arith.mulf %449, %453 : vector<8x32xf32>
    %456 = arith.addf %454, %455 : vector<8x32xf32>
    %457 = math.tanh %456 : vector<8x32xf32>
    %458 = arith.mulf %451, %457 : vector<8x32xf32>
    %c8_i32_152 = arith.constant 8 : i32
    %c1_153 = arith.constant 1 : index
    %c0_154 = arith.constant 0 : index
    %c0_155 = arith.constant 0 : index
    %459 = vector.load %arg10[%c1_153, %c0_154, %c0_155] : memref<2x8x32xf32, #tpu.memory_space<vmem>>, vector<1x8x32xf32>
    %460 = vector.shape_cast %459 : vector<1x8x32xf32> to vector<8x32xf32>
    %461 = vector.shape_cast %458 : vector<8x32xf32> to vector<1x8x32xf32>
    tpu.vector_store %arg10[%c1_153, %c0_154, %c0_155], %461 {strides = array<i32>} : memref<2x8x32xf32, #tpu.memory_space<vmem>>, vector<1x8x32xf32>,
    %c1_156 = arith.constant 1 : index
    %c0_157 = arith.constant 0 : index
    %c0_158 = arith.constant 0 : index
    %462 = vector.load %arg11[%c1_156, %c0_157, %c0_158] : memref<2x8x32xf32, #tpu.memory_space<vmem>>, vector<1x8x32xf32>
    %463 = vector.shape_cast %462 : vector<1x8x32xf32> to vector<8x32xf32>
    %464 = vector.shape_cast %456 : vector<8x32xf32> to vector<1x8x32xf32>
    tpu.vector_store %arg11[%c1_156, %c0_157, %c0_158], %464 {strides = array<i32>} : memref<2x8x32xf32, #tpu.memory_space<vmem>>, vector<1x8x32xf32>,
    %c0_159 = arith.constant 0 : index
    %c0_160 = arith.constant 0 : index
    %c0_161 = arith.constant 0 : index
    %465 = vector.load %arg10[%c0_159, %c0_160, %c0_161] : memref<2x8x32xf32, #tpu.memory_space<vmem>>, vector<2x8x32xf32>
    %c0_162 = arith.constant 0 : index
    %c0_163 = arith.constant 0 : index
    %c0_164 = arith.constant 0 : index
    %466 = vector.load %arg9[%c0_162, %c0_163, %c0_164] : memref<2x8x32xf32, #tpu.memory_space<vmem>>, vector<2x8x32xf32>
    tpu.vector_store %arg9[%c0_162, %c0_163, %c0_164], %465 {strides = array<i32>} : memref<2x8x32xf32, #tpu.memory_space<vmem>>, vector<2x8x32xf32>,
    return
  }
  func.func @transform_0(%arg0: i32, %arg1: i32) -> (i32, i32, i32) {
    %c0_i32 = arith.constant 0 : i32
    %c0_i32_0 = arith.constant 0 : i32
    return %arg1, %arg0, %c0_i32 : i32, i32, i32
  }
  func.func @transform_1(%arg0: i32, %arg1: i32) -> (i32, i32) {
    %c0_i32 = arith.constant 0 : i32
    %c0_i32_0 = arith.constant 0 : i32
    %c0_i32_1 = arith.constant 0 : i32
    return %c0_i32, %c0_i32_0 : i32, i32
  }
  func.func @transform_2(%arg0: i32, %arg1: i32) -> (i32, i32) {
    %c0_i32 = arith.constant 0 : i32
    %c0_i32_0 = arith.constant 0 : i32
    %c0_i32_1 = arith.constant 0 : i32
    return %c0_i32, %c0_i32_0 : i32, i32
  }
  func.func @transform_3(%arg0: i32, %arg1: i32) -> (i32, i32) {
    %c0_i32 = arith.constant 0 : i32
    %c0_i32_0 = arith.constant 0 : i32
    %c0_i32_1 = arith.constant 0 : i32
    return %c0_i32, %c0_i32_0 : i32, i32
  }
  func.func @transform_4(%arg0: i32, %arg1: i32) -> (i32, i32) {
    %c0_i32 = arith.constant 0 : i32
    %c0_i32_0 = arith.constant 0 : i32
    %c0_i32_1 = arith.constant 0 : i32
    return %c0_i32, %c0_i32_0 : i32, i32
  }
  func.func @transform_5(%arg0: i32, %arg1: i32) -> (i32, i32) {
    %c0_i32 = arith.constant 0 : i32
    %c0_i32_0 = arith.constant 0 : i32
    %c0_i32_1 = arith.constant 0 : i32
    return %c0_i32, %c0_i32_0 : i32, i32
  }
  func.func @transform_6(%arg0: i32, %arg1: i32) -> (i32, i32) {
    %c0_i32 = arith.constant 0 : i32
    %c0_i32_0 = arith.constant 0 : i32
    %c0_i32_1 = arith.constant 0 : i32
    return %c0_i32, %c0_i32_0 : i32, i32
  }
  func.func @transform_7(%arg0: i32, %arg1: i32) -> (i32, i32, i32) {
    %c0_i32 = arith.constant 0 : i32
    %c0_i32_0 = arith.constant 0 : i32
    %c0_i32_1 = arith.constant 0 : i32
    return %c0_i32, %arg0, %c0_i32_0 : i32, i32, i32
  }
}

</mosaic_0001>

<bundles_post_ra>
// kernel: tpu_custom_call.1
= control target key start
LH: loop header
LB: loop body
LE: loop exit
PB: predicated region body
PF: predicated region fallthrough
CT: control target
= control target key end

     0   :  { %vm95_vm0 = vcmask 1041408   ;;  %vm32_vm1 = vcmask 261120   ;;  %v1284_v8 = vmov 0.0   ;;  %s1607_s0 = inlined_call_operand.vmem [shape: f32[8,8,4], index: 0, kind: input, shape index: {}]   ;;  %s1608_s1 = inlined_call_operand.vmem [shape: bf16[4,128], index: 1, kind: input, shape index: {}]   ;;  %s1609_s2 = inlined_call_operand.vmem [shape: bf16[32,128], index: 2, kind: input, shape index: {}]   ;;  %s1610_s3 = inlined_call_operand.vmem [shape: f32[1,128], index: 3, kind: input, shape index: {}]   ;;  %s1611_s4 = inlined_call_operand.vmem [shape: bf16[32,128], index: 4, kind: input, shape index: {}]   ;;  %s1612_s5 = inlined_call_operand.vmem [shape: bf16[32,128], index: 5, kind: input, shape index: {}]   ;;  %s1613_s6 = inlined_call_operand.vmem [shape: f32[1,128], index: 6, kind: input, shape index: {}]   ;;  %s1614_s7 = inlined_call_operand.hbm [shape: f32[2,8,32], index: 7, kind: output, shape index: {}]  }
   0x1   :  { %v37_v0 = vld [vmem:[%s1608_s1] sm:$0x3]  ;;  %v1337_v1 = vld [vmem:[%s1609_s2 + $0x8] sm:$0xff]  ;;  %33 = vst.msk [vmem:[#allocation2] sm:$0xff] %vm32_vm1, %v1284_v8 }
   0x2   :  { %v43_v2 = vld [vmem:[%s1607_s0] sm:$0xff]  ;;  %v97_v3 = vsel %vm95_vm0, %v37_v0, 0  ;;  %v44_v4 = vld [vmem:[%s1607_s0 + $0x8] sm:$0xff]  ;;  %162 = vmatpush.bf16.msra.mxu1 %v1337_v1  ;;  %34 = vst.msk [vmem:[#allocation2 + $0x8] sm:$0xff] %vm32_vm1, %v1284_v8  ;;  %218 = vmatpush.bf16.msra.mxu2 %v1337_v1 }
   0x3   :  { %v51_v5 = vpack.c.bf16 %v43_v2, %v43_v2  ;;  %106 = vmatpush.bf16.msra.mxu0 %v97_v3  ;;  %v52_v6 = vpack.c.bf16 %v44_v4, %v44_v4  ;;  %v1349_v7 = vld [vmem:[%s1609_s2] sm:$0xff]  ;;  %270 = vmatpush.bf16.msra.mxu3 %v1337_v1 }
   0x5   :  { %v70_v9 = vunpack.c.l.b16 %v51_v5 }
   0x6   :  { %12 = vsyncpa [#allocation7], 0  ;;  %v71_v10 = vunpack.c.l.b16 %v52_v6  ;;  %35 = vst.msk [vmem:[#allocation3] sm:$0xff] %vm32_vm1, %v1284_v8  ;;  %vm82_vm2 = vcmask 31744   ;;  %163 = vmatpush.bf16.msra.mxu1 %v1349_v7  ;;  %219 = vmatpush.bf16.msra.mxu2 %v1349_v7  ;;  %v1373_v14 = vld [vmem:[%s1610_s3] ss:$0 sm:$0xff] }
   0x7   :  { %36 = vst.msk [vmem:[#allocation3 + $0x8] sm:$0xff] %vm32_vm1, %v1284_v8  ;;  %271 = vmatpush.bf16.msra.mxu3 %v1349_v7  ;;  %s1285_s11 = smov 32   ;;  %s1286_s3 = smov 64   ;;  %v45_v55 = vld [vmem:[%s1607_s0 + $0x10] sm:$0xff]  ;;  %v46_v56 = vld [vmem:[%s1607_s0 + $0x18] sm:$0xff]  ;;  %vm201_vm3 = vcmask 257024  }
   0x8   :  { %v78_v11 = vpack.c.b16 %v71_v10, %v70_v9  ;;  %v136_v12 = vld [vmem:[#allocation2] sm:$0xff]  ;;  %v53_v57 = vpack.c.bf16 %v45_v55, %v45_v55  ;;  %v54_v58 = vpack.c.bf16 %v46_v56, %v46_v56  ;;  %s1288_s8 = smov [#allocation6]   ;;  %s1067_s10 = sshll.u32 %s1614_s7, 4  ;;  %s1068_s10 = int_to_ptr.hbm [resolvable:$true] %s1067_s10 }
   0x9   :  { %v139_v13 = vpack.c.bf16 %v136_v12, %v136_v12  ;;  %s1065_s1 = sshll.u32 %s1288_s8, 4  ;;  %s1066_s1 = int_to_ptr.vmem [resolvable:$true] %s1065_s1 }
   0xa   :  { %1079 = vmatmul.msk.bf16.vlgmr.msra.gmra.mxu0 %vm82_vm2, %v78_v11  ;;  %322 = vmatpush.bf16.msrb.mxu1 %v1337_v1  ;;  %v72_v59 = vunpack.c.l.b16 %v53_v57  ;;  %v73_v60 = vunpack.c.l.b16 %v54_v58 }
   0xb   :  { %374 = vmatpush.bf16.msrb.mxu2 %v1337_v1  ;;  %426 = vmatpush.bf16.msrb.mxu3 %v1337_v1 }
   0xc   :  { %1091 = vmatmul.msk.bf16.vlgmr.msra.gmra.mxu1 %vm32_vm1, %v139_v13  ;;  %v79_v61 = vpack.c.b16 %v73_v60, %v72_v59 }
   0xd   :  { %v137_v21 = vld [vmem:[#allocation3] sm:$0xff] }
   0xe   :  { %323 = vmatpush.bf16.msrb.mxu1 %v1349_v7 }
   0xf   :  { %375 = vmatpush.bf16.msrb.mxu2 %v1349_v7  ;;  %427 = vmatpush.bf16.msrb.mxu3 %v1349_v7 }
  0x12   :  { %478 = vmatpush.bf16.msra.mxu1 %v1337_v1 }
  0x16   :  { %479 = vmatpush.bf16.msra.mxu1 %v1349_v7 }
  0x1a   :  { %1080 = vmatmul.msk.bf16.gmra.mxu0 %vm82_vm2, %v79_v61 }
  0x87   :  { %v108_v15 = vpop.f32.mrf.mxu0 }
  0x88   :  { %v109_v16 = vadd.f32 %v1373_v14, %v108_v15 }
  0x89   :  { %v165_v17 = vpop.f32.mrf.mxu1 }
  0x8a   :  { %v169_v18 = vadd.f32 %v165_v17, %v109_v16 }
  0x8c   :  { %1162 = vtanh.f32 %v169_v18  ;;  %v170_v22 = vmul.f32 0.5, %v169_v18 }
  0x8e   :  { %1164 = vtanh.f32 %v170_v22 }
  0x8f   :  { %v110_v39 = vpop.f32.mrf.mxu0 }
  0x90   :  { %v111_v40 = vadd.f32 %v1373_v14, %v110_v39 }
  0x91   :  { %v167_v19 = vpop.f32.mrf.mxu1 }
  0x92   :  { %v1163_v20 = vpop.eup %1162 }
  0x93   :  { %181 = vrot.lane.b32.xlu0 %v1163_v20, %s1285_s11 }
  0x94   :  { %v1165_v23 = vpop.eup %1164 }
  0x95   :  { %v172_v24 = vmul.f32 0.5, %v1165_v23 }
  0x97   :  { %v173_v25 = vadd.f32 0.5, %v172_v24  ;;  %v113_v4 = vpop.f32.mrf.mxu0 }
  0x98   :  { %v114_v5 = vadd.f32 %v1373_v14, %v113_v4 }
  0x9b   :  { %176 = vrot.lane.b32.xlu0 %v137_v21, %s1285_s11 }
 0x105   :  { %v182_v26 = vpop.permute.xlu0 %181 }
 0x106   :  { %v184_v27 = vmul.f32 %v182_v26, %v173_v25 }
 0x108   :  { %186 = vrot.lane.b32.xlu1 %v184_v27, %s1285_s11  ;;  %v115_v27 = vpop.f32.mrf.mxu0 }
 0x10d   :  { %v177_v28 = vpop.permute.xlu0 %176 }
 0x10e   :  { %v179_v29 = vmul.f32 %v177_v28, %v173_v25  ;;  %v116_v28 = vadd.f32 %v1373_v14, %v115_v27 }
 0x17a   :  { %v187_v30 = vpop.permute.xlu1 %186 }
 0x17b   :  { %v189_v31 = vadd.f32 %v187_v30, %v179_v29 }
 0x17d   :  { %1166 = vtanh.f32 %v189_v31 }
 0x183   :  { %v1167_v32 = vpop.eup %1166 }
 0x184   :  { %192 = vrot.lane.b32.xlu1 %v1167_v32, %s1285_s11 }
 0x1f6   :  { %v193_v33 = vpop.permute.xlu1 %192 }
 0x1f7   :  { %v195_v34 = vmul.f32 %v193_v33, %v173_v25 }
 0x1f9   :  { %v1380_v35 = vpack.c.bf16 %v195_v34, %v195_v34 }
 0x1fb   :  { %v205_v36 = vunpack.c.l.b16 %v1380_v35 }
 0x1fd   :  { %v206_v37 = vpack.c.b16 %v205_v36, %v205_v36 }
 0x1ff   :  { %207 = vrot.lane.b32.xlu2 %v206_v37, %s1286_s3 }
 0x259   :  { %v208_v38 = vpop.permute.xlu2 %207 }
 0x25a   :  { %1092 = vmatmul.msk.bf16.vlgmr.msra.gmra.mxu2 %vm32_vm1, %v208_v38 }
 0x25b   :  { %530 = vmatpush.bf16.msra.mxu2 %v1337_v1 }
 0x25f   :  { %531 = vmatpush.bf16.msra.mxu2 %v1349_v7 }
 0x2dd   :  { %v221_v41 = vpop.f32.mrf.mxu2 }
 0x2de   :  { %v225_v42 = vadd.f32 %v221_v41, %v111_v40 }
 0x2e0   :  { %1168 = vtanh.f32 %v225_v42  ;;  %v226_v45 = vmul.f32 0.5, %v225_v42 }
 0x2e2   :  { %1170 = vtanh.f32 %v226_v45  ;;  %v48_v45 = vld [vmem:[%s1607_s0 + $0x28] sm:$0xff] }
 0x2e5   :  { %v223_v43 = vpop.f32.mrf.mxu2 }
 0x2e6   :  { %v1169_v44 = vpop.eup %1168 }
 0x2e7   :  { %233 = vrot.lane.b32.xlu2 %v1169_v44, %s1285_s11  ;;  %v47_v44 = vld [vmem:[%s1607_s0 + $0x20] sm:$0xff] }
 0x2e8   :  { %v1171_v46 = vpop.eup %1170 }
 0x2e9   :  { %v228_v47 = vmul.f32 0.5, %v1171_v46  ;;  %v55_v46 = vpack.c.bf16 %v47_v44, %v47_v44 }
 0x2eb   :  { %v229_v48 = vadd.f32 0.5, %v228_v47  ;;  %v56_v47 = vpack.c.bf16 %v48_v45, %v48_v45 }
 0x2ed   :  { %v231_v51 = vmul.f32 %v229_v48, %v189_v31 }
 0x341   :  { %v234_v49 = vpop.permute.xlu2 %233 }
 0x342   :  { %v236_v50 = vmul.f32 %v234_v49, %v229_v48  ;;  %v75_v49 = vunpack.c.l.b16 %v56_v47 }
 0x344   :  { %238 = vrot.lane.b32.xlu0 %v236_v50, %s1285_s11 }
 0x3b6   :  { %v239_v52 = vpop.permute.xlu0 %238 }
 0x3b7   :  { %v241_v53 = vadd.f32 %v239_v52, %v231_v51 }
 0x3b9   :  { %1172 = vtanh.f32 %v241_v53 }
 0x3bf   :  { %v1173_v54 = vpop.eup %1172 }
 0x3c0   :  { %244 = vrot.lane.b32.xlu1 %v1173_v54, %s1285_s11 }
 0x432   :  { %v245_v62 = vpop.permute.xlu1 %244 }
 0x433   :  { %v247_v63 = vmul.f32 %v245_v62, %v229_v48  ;;  %v74_v48 = vunpack.c.l.b16 %v55_v46 }
 0x435   :  { %v1398_v0 = vpack.c.bf16 %v247_v63, %v247_v63  ;;  %v80_v50 = vpack.c.b16 %v75_v49, %v74_v48 }
 0x437   :  { %v257_v1 = vunpack.c.l.b16 %v1398_v0  ;;  %1081 = vmatmul.msk.bf16.gmra.mxu0 %vm82_vm2, %v80_v50  ;;  %v1471_v50 = vld [vmem:[%s1612_s5 + $0x8] sm:$0xff] }
 0x438   :  { %797 = vmatpush.bf16.msrb.mxu0 %v1471_v50 }
 0x439   :  { %v258_v2 = vpack.c.b16 %v257_v1, %v257_v1 }
 0x43b   :  { %259 = vrot.lane.b32.xlu2 %v258_v2, %s1286_s3 }
 0x495   :  { %v260_v3 = vpop.permute.xlu2 %259 }
 0x496   :  { %1093 = vmatmul.msk.bf16.vlgmr.msra.gmra.mxu3 %vm32_vm1, %v260_v3 }
 0x4b4   :  { %v118_v57 = vpop.f32.mrf.mxu0 }
 0x4b5   :  { %v119_v58 = vadd.f32 %v1373_v14, %v118_v57 }
 0x519   :  { %v273_v6 = vpop.f32.mrf.mxu3 }
 0x51a   :  { %v277_v7 = vadd.f32 %v273_v6, %v114_v5 }
 0x51c   :  { %1174 = vtanh.f32 %v277_v7  ;;  %v278_v10 = vmul.f32 0.5, %v277_v7 }
 0x51e   :  { %1176 = vtanh.f32 %v278_v10 }
 0x521   :  { %v275_v8 = vpop.f32.mrf.mxu3 }
 0x522   :  { %v1175_v9 = vpop.eup %1174 }
 0x523   :  { %285 = vrot.lane.b32.xlu0 %v1175_v9, %s1285_s11 }
 0x524   :  { %v1177_v11 = vpop.eup %1176 }
 0x525   :  { %v280_v12 = vmul.f32 0.5, %v1177_v11 }
 0x527   :  { %v281_v13 = vadd.f32 0.5, %v280_v12 }
 0x529   :  { %v283_v17 = vmul.f32 %v281_v13, %v241_v53 }
 0x595   :  { %v286_v15 = vpop.permute.xlu0 %285 }
 0x596   :  { %v288_v16 = vmul.f32 %v286_v15, %v281_v13 }
 0x598   :  { %290 = vrot.lane.b32.xlu1 %v288_v16, %s1285_s11 }
 0x60a   :  { %v291_v18 = vpop.permute.xlu1 %290 }
 0x60b   :  { %v293_v19 = vadd.f32 %v291_v18, %v283_v17  ;;  %v120_v17 = vpop.f32.mrf.mxu0 }
 0x60c   :  { %v121_v18 = vadd.f32 %v1373_v14, %v120_v17 }
 0x60d   :  { %1178 = vtanh.f32 %v293_v19 }
 0x613   :  { %v1179_v20 = vpop.eup %1178 }
 0x614   :  { %296 = vrot.lane.b32.xlu2 %v1179_v20, %s1285_s11 }
 0x66e   :  { %v297_v21 = vpop.permute.xlu2 %296 }
 0x66f   :  { %v299_v22 = vmul.f32 %v297_v21, %v281_v13 }
 0x671   :  { %v1407_v23 = vpack.c.bf16 %v299_v22, %v299_v22 }
 0x673   :  { %v309_v24 = vunpack.c.l.b16 %v1407_v23 }
 0x675   :  { %v310_v25 = vpack.c.b16 %v309_v24, %v309_v24 }
 0x677   :  { %311 = vrot.lane.b32.xlu0 %v310_v25, %s1286_s3 }
 0x6e9   :  { %v312_v26 = vpop.permute.xlu0 %311 }
 0x6ea   :  { %1094 = vmatmul.msk.bf16.vlgmr.msrb.gmra.mxu1 %vm32_vm1, %v312_v26 }
 0x6eb   :  { %705 = vmatpush.bf16.msrb.mxu1 %v1471_v50 }
 0x767   :  { %v325_v29 = vpop.f32.mrf.mxu1 }
 0x768   :  { %v329_v30 = vadd.f32 %v325_v29, %v116_v28 }
 0x76a   :  { %1180 = vtanh.f32 %v329_v30  ;;  %v330_v33 = vmul.f32 0.5, %v329_v30 }
 0x76c   :  { %1182 = vtanh.f32 %v330_v33 }
 0x76f   :  { %v327_v31 = vpop.f32.mrf.mxu1 }
 0x770   :  { %v1181_v32 = vpop.eup %1180 }
 0x771   :  { %337 = vrot.lane.b32.xlu1 %v1181_v32, %s1285_s11 }
 0x772   :  { %v1183_v34 = vpop.eup %1182 }
 0x773   :  { %v332_v36 = vmul.f32 0.5, %v1183_v34 }
 0x775   :  { %v333_v37 = vadd.f32 0.5, %v332_v36  ;;  %v1145_v36 = vld [vmem:[%s1611_s4] sm:$0xff] }
 0x777   :  { %v335_v40 = vmul.f32 %v333_v37, %v293_v19 }
 0x7e3   :  { %v338_v38 = vpop.permute.xlu1 %337 }
 0x7e4   :  { %v340_v39 = vmul.f32 %v338_v38, %v333_v37  ;;  %v50_v38 = vld [vmem:[%s1607_s0 + $0x38] sm:$0xff] }
 0x7e6   :  { %342 = vrot.lane.b32.xlu2 %v340_v39, %s1285_s11 }
 0x840   :  { %v343_v41 = vpop.permute.xlu2 %342 }
 0x841   :  { %v345_v42 = vadd.f32 %v343_v41, %v335_v40 }
 0x843   :  { %1184 = vtanh.f32 %v345_v42 }
 0x849   :  { %v1185_v43 = vpop.eup %1184 }
 0x84a   :  { %348 = vrot.lane.b32.xlu0 %v1185_v43, %s1285_s11 }
 0x8bc   :  { %v349_v51 = vpop.permute.xlu0 %348 }
 0x8bd   :  { %v351_v52 = vmul.f32 %v349_v51, %v333_v37  ;;  %v49_v37 = vld [vmem:[%s1607_s0 + $0x30] sm:$0xff]  ;;  %v1477_v51 = vld [vmem:[%s1612_s5] sm:$0xff] }
 0x8be   :  { %v57_v39 = vpack.c.bf16 %v49_v37, %v49_v37  ;;  %706 = vmatpush.bf16.msrb.mxu1 %v1477_v51  ;;  %798 = vmatpush.bf16.msrb.mxu0 %v1477_v51 }
 0x8bf   :  { %v1423_v53 = vpack.c.bf16 %v351_v52, %v351_v52 }
 0x8c0   :  { %v76_v40 = vunpack.c.l.b16 %v57_v39 }
 0x8c1   :  { %v361_v54 = vunpack.c.l.b16 %v1423_v53 }
 0x8c2   :  { %929 = vmatpush.bf16.msra.mxu0 %v1471_v50 }
 0x8c3   :  { %v362_v55 = vpack.c.b16 %v361_v54, %v361_v54  ;;  %v679_v54 = vld [vmem:[#allocation2 + $0x8] sm:$0xff] }
 0x8c5   :  { %363 = vrot.lane.b32.xlu1 %v362_v55, %s1286_s3  ;;  %v683_v55 = vpack.c.bf16 %v679_v54, %v679_v54 }
 0x8c6   :  { %930 = vmatpush.bf16.msra.mxu0 %v1477_v51 }
 0x937   :  { %v364_v56 = vpop.permute.xlu1 %363 }
 0x938   :  { %1095 = vmatmul.msk.bf16.vlgmr.msrb.gmra.mxu2 %vm32_vm1, %v364_v56 }
 0x939   :  { %753 = vmatpush.bf16.msrb.mxu2 %v1471_v50 }
 0x93d   :  { %754 = vmatpush.bf16.msrb.mxu2 %v1477_v51 }
 0x9bb   :  { %v377_v59 = vpop.f32.mrf.mxu2 }
 0x9bc   :  { %v381_v60 = vadd.f32 %v377_v59, %v119_v58 }
 0x9be   :  { %1186 = vtanh.f32 %v381_v60  ;;  %v382_v63 = vmul.f32 0.5, %v381_v60 }
 0x9c0   :  { %1188 = vtanh.f32 %v382_v63 }
 0x9c3   :  { %v379_v61 = vpop.f32.mrf.mxu2 }
 0x9c4   :  { %v1187_v62 = vpop.eup %1186 }
 0x9c5   :  { %389 = vrot.lane.b32.xlu2 %v1187_v62, %s1285_s11  ;;  %v1497_v62 = vld [vmem:[%s1613_s6] ss:$0 sm:$0xff]  ;;  %s1287_s6 = smov 96  }
 0x9c6   :  { %v1189_v1 = vpop.eup %1188 }
 0x9c7   :  { %v384_v2 = vmul.f32 0.5, %v1189_v1 }
 0x9c9   :  { %v385_v3 = vadd.f32 0.5, %v384_v2  ;;  %v681_v2 = vld [vmem:[#allocation3 + $0x8] sm:$0xff] }
 0x9cb   :  { %v387_v6 = vmul.f32 %v385_v3, %v345_v42 }
 0xa1f   :  { %v390_v4 = vpop.permute.xlu2 %389 }
 0xa20   :  { %v392_v5 = vmul.f32 %v390_v4, %v385_v3 }
 0xa22   :  { %394 = vrot.lane.b32.xlu0 %v392_v5, %s1285_s11 }
 0xa94   :  { %v395_v7 = vpop.permute.xlu0 %394 }
 0xa95   :  { %v397_v8 = vadd.f32 %v395_v7, %v387_v6 }
 0xa97   :  { %1190 = vtanh.f32 %v397_v8 }
 0xa9d   :  { %v1191_v9 = vpop.eup %1190 }
 0xa9e   :  { %400 = vrot.lane.b32.xlu1 %v1191_v9, %s1285_s11 }
 0xb10   :  { %v401_v10 = vpop.permute.xlu1 %400 }
 0xb11   :  { %v403_v11 = vmul.f32 %v401_v10, %v385_v3 }
 0xb13   :  { %v1432_v12 = vpack.c.bf16 %v403_v11, %v403_v11 }
 0xb15   :  { %v413_v13 = vunpack.c.l.b16 %v1432_v12 }
 0xb17   :  { %v414_v15 = vpack.c.b16 %v413_v13, %v413_v13 }
 0xb19   :  { %415 = vrot.lane.b32.xlu2 %v414_v15, %s1286_s3 }
 0xb73   :  { %v416_v16 = vpop.permute.xlu2 %415 }
 0xb74   :  { %1096 = vmatmul.msk.bf16.vlgmr.msrb.gmra.mxu3 %vm32_vm1, %v416_v16 }
 0xbf7   :  { %v429_v19 = vpop.f32.mrf.mxu3 }
 0xbf8   :  { %v433_v20 = vadd.f32 %v429_v19, %v121_v18 }
 0xbfa   :  { %1192 = vtanh.f32 %v433_v20  ;;  %v434_v24 = vmul.f32 0.5, %v433_v20 }
 0xbfc   :  { %1194 = vtanh.f32 %v434_v24 }
 0xbff   :  { %v431_v21 = vpop.f32.mrf.mxu3 }
 0xc00   :  { %v1193_v22 = vpop.eup %1192 }
 0xc01   :  { %441 = vrot.lane.b32.xlu0 %v1193_v22, %s1285_s11 }
 0xc02   :  { %v1195_v25 = vpop.eup %1194 }
 0xc03   :  { %v436_v26 = vmul.f32 0.5, %v1195_v25 }
 0xc05   :  { %v437_v27 = vadd.f32 0.5, %v436_v26 }
 0xc07   :  { %v439_v30 = vmul.f32 %v437_v27, %v397_v8 }
 0xc73   :  { %v442_v28 = vpop.permute.xlu0 %441 }
 0xc74   :  { %v444_v29 = vmul.f32 %v442_v28, %v437_v27 }
 0xc76   :  { %446 = vrot.lane.b32.xlu1 %v444_v29, %s1285_s11 }
 0xc7e   :  { %198 = vrot.lane.b32.xlu1 %v1380_v35, %s1286_s3  ;;  %v1146_v35 = vld [vmem:[%s1611_s4 + $0x8] sm:$0xff] }
 0xc7f   :  { %647 = vmatpush.bf16.msra.mxu3 %v1146_v35 }
 0xc83   :  { %648 = vmatpush.bf16.msra.mxu3 %v1145_v36 }
 0xce8   :  { %v447_v31 = vpop.permute.xlu1 %446 }
 0xce9   :  { %v1442_v32 = vadd.f32 %v447_v31, %v439_v30 }
 0xceb   :  { %1196 = vtanh.f32 %v1442_v32 }
 0xcf0   :  { %v199_v33 = vpop.permute.xlu1 %198 }
 0xcf1   :  { %v1197_v34 = vpop.eup %1196  ;;  %202 = vst.msk [vmem:[#allocation4] sm:$0xf] %vm201_vm3, %v199_v33 }
 0xcf2   :  { %452 = vrot.lane.b32.xlu2 %v1197_v34, %s1285_s11 }
 0xcfa   :  { %250 = vrot.lane.b32.xlu2 %v1398_v0, %s1286_s3  ;;  %v58_v0 = vpack.c.bf16 %v50_v38, %v50_v38 }
 0xcfc   :  { %v77_v41 = vunpack.c.l.b16 %v58_v0 }
 0xcfe   :  { %v81_v42 = vpack.c.b16 %v77_v41, %v76_v40 }
 0xd00   :  { %1082 = vmatmul.msk.bf16.gmra.mxu0 %vm82_vm2, %v81_v42 }
 0xd4c   :  { %v453_v43 = vpop.permute.xlu2 %452 }
 0xd4d   :  { %v455_v44 = vmul.f32 %v453_v43, %v437_v27 }
 0xd4f   :  { %v1462_v45 = vpack.c.bf16 %v455_v44, %v455_v44 }
 0xd51   :  { %v465_v46 = vunpack.c.l.b16 %v1462_v45 }
 0xd53   :  { %v466_v47 = vpack.c.b16 %v465_v46, %v465_v46 }
 0xd54   :  { %v251_v48 = vpop.permute.xlu2 %250 }
 0xd55   :  { %254 = vst.msk [vmem:[#allocation4 + $0x4] sm:$0xf] %vm201_vm3, %v251_v48  ;;  %467 = vrot.lane.b32.xlu0 %v466_v47, %s1286_s3 }
 0xd5c   :  { %v1149_v49 = vld [vmem:[#allocation4] sm:$0xff] }
 0xd5d   :  { %1123 = vmatmul.msk.bf16.vlgmr.msra.gmra.mxu3 %vm32_vm1, %v1149_v49 }
 0xd7d   :  { %v123_v56 = vpop.f32.mrf.mxu0 }
 0xd7e   :  { %v124_v57 = vadd.f32 %v1373_v14, %v123_v56 }
 0xdc7   :  { %v468_v52 = vpop.permute.xlu0 %467 }
 0xdc8   :  { %1097 = vmatmul.msk.bf16.vlgmr.msra.gmra.mxu1 %vm32_vm1, %v468_v52 }
 0xdc9   :  { %841 = vmatpush.bf16.msra.mxu1 %v1471_v50 }
 0xdcd   :  { %842 = vmatpush.bf16.msra.mxu1 %v1477_v51 }
 0xdd8   :  { %1135 = vmatmul.msk.bf16.vlgmr.msrb.gmra.mxu1 %vm32_vm1, %v683_v55 }
 0xdd9   :  { %973 = vmatpush.bf16.msrb.mxu1 %v1471_v50 }
 0xddd   :  { %974 = vmatpush.bf16.msrb.mxu1 %v1477_v51 }
 0xde0   :  { %v650_v63 = vpop.f32.mrf.mxu3 }
 0xde1   :  { %v651_v1 = vadd.f32 %v1497_v62, %v650_v63 }
 0xde8   :  { %v652_v42 = vpop.f32.mrf.mxu3 }
 0xde9   :  { %v653_v43 = vadd.f32 %v1497_v62, %v652_v42 }
 0xe45   :  { %v481_v58 = vpop.f32.mrf.mxu1 }
 0xe46   :  { %v485_v59 = vadd.f32 %v481_v58, %v124_v57 }
 0xe48   :  { %1198 = vtanh.f32 %v485_v59  ;;  %v486_v7 = vmul.f32 0.5, %v485_v59 }
 0xe4d   :  { %v483_v60 = vpop.f32.mrf.mxu1 }
 0xe4e   :  { %v1199_v61 = vpop.eup %1198 }
 0xe4f   :  { %493 = vrot.lane.b32.xlu0 %v1199_v61, %s1285_s11 }
 0xe55   :  { %v708_v3 = vpop.f32.mrf.mxu1 }
 0xe56   :  { %v712_v4 = vadd.f32 %v708_v3, %v651_v1 }
 0xe57   :  { %719 = vrot.lane.b32.xlu0 %v681_v2, %s1285_s11 }
 0xe58   :  { %1200 = vtanh.f32 %v712_v4  ;;  %v713_v10 = vmul.f32 0.5, %v712_v4 }
 0xe59   :  { %1202 = vtanh.f32 %v486_v7 }
 0xe5a   :  { %1204 = vtanh.f32 %v713_v10 }
 0xe5d   :  { %v710_v5 = vpop.f32.mrf.mxu1 }
 0xe5e   :  { %v1201_v6 = vpop.eup %1200 }
 0xe5f   :  { %724 = vrot.lane.b32.xlu1 %v1201_v6, %s1285_s11  ;;  %v1203_v8 = vpop.eup %1202 }
 0xe60   :  { %v488_v9 = vmul.f32 0.5, %v1203_v8  ;;  %v1205_v16 = vpop.eup %1204 }
 0xe61   :  { %v715_v17 = vmul.f32 0.5, %v1205_v16 }
 0xe62   :  { %v489_v11 = vadd.f32 0.5, %v488_v9 }
 0xe63   :  { %v716_v18 = vadd.f32 0.5, %v715_v17 }
 0xe64   :  { %v491_v21 = vmul.f32 %v489_v11, %v1442_v32 }
 0xec1   :  { %v494_v13 = vpop.permute.xlu0 %493 }
 0xec2   :  { %v496_v15 = vmul.f32 %v494_v13, %v489_v11 }
 0xec4   :  { %498 = vrot.lane.b32.xlu2 %v496_v15, %s1285_s11 }
 0xec9   :  { %v720_v26 = vpop.permute.xlu0 %719 }
 0xeca   :  { %v722_v27 = vmul.f32 %v720_v26, %v716_v18 }
 0xed1   :  { %v725_v19 = vpop.permute.xlu1 %724 }
 0xed2   :  { %v727_v20 = vmul.f32 %v725_v19, %v716_v18 }
 0xed4   :  { %729 = vrot.lane.b32.xlu1 %v727_v20, %s1285_s11 }
 0xf1e   :  { %v499_v22 = vpop.permute.xlu2 %498 }
 0xf1f   :  { %v1505_v24 = vadd.f32 %v499_v22, %v491_v21 }
 0xf21   :  { %1206 = vtanh.f32 %v1505_v24 }
 0xf27   :  { %v1207_v25 = vpop.eup %1206 }
 0xf28   :  { %504 = vrot.lane.b32.xlu2 %v1207_v25, %s1285_s11 }
 0xf46   :  { %v730_v28 = vpop.permute.xlu1 %729 }
 0xf47   :  { %v732_v29 = vadd.f32 %v730_v28, %v722_v27 }
 0xf49   :  { %1208 = vtanh.f32 %v732_v29 }
 0xf4f   :  { %v1209_v30 = vpop.eup %1208 }
 0xf50   :  { %735 = vrot.lane.b32.xlu0 %v1209_v30, %s1285_s11 }
 0xf82   :  { %v505_v31 = vpop.permute.xlu2 %504 }
 0xf83   :  { %v507_v33 = vmul.f32 %v505_v31, %v489_v11 }
 0xf85   :  { %v1510_v34 = vpack.c.bf16 %v507_v33, %v507_v33 }
 0xf87   :  { %v517_v32 = vunpack.c.l.b16 %v1510_v34 }
 0xf89   :  { %v518_v35 = vpack.c.b16 %v517_v32, %v517_v32 }
 0xf8b   :  { %519 = vrot.lane.b32.xlu1 %v518_v35, %s1286_s3 }
 0xfc2   :  { %v736_v36 = vpop.permute.xlu0 %735 }
 0xfc3   :  { %v738_v37 = vmul.f32 %v736_v36, %v716_v18 }
 0xfc5   :  { %v740_v38 = vpack.c.bf16 %v738_v37, %v738_v37 }
 0xfc7   :  { %742 = vrot.lane.b32.xlu2 %v740_v38, %s1286_s3 }
 0xffd   :  { %v520_v39 = vpop.permute.xlu1 %519 }
 0xffe   :  { %1098 = vmatmul.msk.bf16.vlgmr.msra.gmra.mxu2 %vm32_vm1, %v520_v39 }
 0xfff   :  { %885 = vmatpush.bf16.msra.mxu2 %v1471_v50 }
0x1003   :  { %886 = vmatpush.bf16.msra.mxu2 %v1477_v51 }
0x1021   :  { %v743_v0 = vpop.permute.xlu2 %742 }
0x1022   :  { %1136 = vmatmul.msk.bf16.vlgmr.msrb.gmra.mxu2 %vm32_vm1, %v743_v0 }
0x1023   :  { %1017 = vmatpush.bf16.msrb.mxu2 %v1471_v50 }
0x1027   :  { %1018 = vmatpush.bf16.msrb.mxu2 %v1477_v51 }
0x1081   :  { %v1521_v40 = vpop.f32.mrf.mxu2 }
0x1089   :  { %v535_v41 = vpop.f32.mrf.mxu2 }
0x10a5   :  { %v756_v44 = vpop.f32.mrf.mxu2 }
0x10a6   :  { %v760_v46 = vadd.f32 %v756_v44, %v653_v43 }
0x10a8   :  { %1210 = vtanh.f32 %v760_v46  ;;  %v761_v49 = vmul.f32 0.5, %v760_v46 }
0x10aa   :  { %1212 = vtanh.f32 %v761_v49 }
0x10ad   :  { %v758_v47 = vpop.f32.mrf.mxu2 }
0x10ae   :  { %v1211_v48 = vpop.eup %1210 }
0x10af   :  { %768 = vrot.lane.b32.xlu0 %v1211_v48, %s1285_s11 }
0x10b0   :  { %v1213_v50 = vpop.eup %1212 }
0x10b1   :  { %v763_v51 = vmul.f32 0.5, %v1213_v50 }
0x10b3   :  { %v764_v52 = vadd.f32 0.5, %v763_v51 }
0x10b5   :  { %v766_v57 = vmul.f32 %v764_v52, %v732_v29 }
0x10b7   :  { %302 = vrot.lane.b32.xlu0 %v1407_v23, %s1286_s3 }
0x1121   :  { %v769_v54 = vpop.permute.xlu0 %768 }
0x1122   :  { %v771_v55 = vmul.f32 %v769_v54, %v764_v52 }
0x1124   :  { %773 = vrot.lane.b32.xlu1 %v771_v55, %s1285_s11 }
0x1129   :  { %v303_v56 = vpop.permute.xlu0 %302 }
0x112a   :  { %306 = vst.msk [vmem:[#allocation4 + $0x8] sm:$0xf] %vm201_vm3, %v303_v56 }
0x112c   :  { %354 = vrot.lane.b32.xlu1 %v1423_v53, %s1286_s3  ;;  %v1536_v53 = vpop.f32.mrf.mxu0 }
0x1196   :  { %v774_v58 = vpop.permute.xlu1 %773 }
0x1197   :  { %v776_v59 = vadd.f32 %v774_v58, %v766_v57 }
0x1199   :  { %1214 = vtanh.f32 %v776_v59 }
0x119e   :  { %v355_v23 = vpop.permute.xlu1 %354 }
0x119f   :  { %v1215_v60 = vpop.eup %1214  ;;  %358 = vst.msk [vmem:[#allocation4 + $0xc] sm:$0xf] %vm201_vm3, %v355_v23 }
0x11a0   :  { %779 = vrot.lane.b32.xlu2 %v1215_v60, %s1285_s11  ;;  %v126_v60 = vadd.f32 %v1373_v14, %v1536_v53 }
0x11a6   :  { %v1150_v61 = vld [vmem:[#allocation4 + $0x8] sm:$0xff] }
0x11a7   :  { %1124 = vmatmul.msk.bf16.gmra.mxu3 %vm32_vm1, %v1150_v61 }
0x11fa   :  { %v780_v63 = vpop.permute.xlu2 %779 }
0x11fb   :  { %v782_v1 = vmul.f32 %v780_v63, %v764_v52  ;;  %v537_v63 = vadd.f32 %v1521_v40, %v126_v60 }
0x11fd   :  { %v784_v2 = vpack.c.bf16 %v782_v1, %v782_v1 }
0x11ff   :  { %786 = vrot.lane.b32.xlu2 %v784_v2, %s1286_s3 }
0x122a   :  { %v655_v4 = vpop.f32.mrf.mxu3 }
0x122b   :  { %v656_v5 = vadd.f32 %v1497_v62, %v655_v4 }
0x1232   :  { %v657_v28 = vpop.f32.mrf.mxu3 }
0x1233   :  { %v658_v29 = vadd.f32 %v1497_v62, %v657_v28 }
0x1259   :  { %v787_v3 = vpop.permute.xlu2 %786 }
0x125a   :  { %1137 = vmatmul.msk.bf16.vlgmr.msrb.gmra.mxu0 %vm32_vm1, %v787_v3 }
0x12d7   :  { %v800_v6 = vpop.f32.mrf.mxu0 }
0x12d8   :  { %v804_v7 = vadd.f32 %v800_v6, %v656_v5 }
0x12da   :  { %1216 = vtanh.f32 %v804_v7  ;;  %v805_v10 = vmul.f32 0.5, %v804_v7 }
0x12dc   :  { %1218 = vtanh.f32 %v805_v10 }
0x12df   :  { %v802_v8 = vpop.f32.mrf.mxu0 }
0x12e0   :  { %v1217_v9 = vpop.eup %1216  ;;  %v538_v8 = vmul.f32 0.5, %v537_v63 }
0x12e1   :  { %812 = vrot.lane.b32.xlu0 %v1217_v9, %s1285_s11 }
0x12e2   :  { %v1219_v11 = vpop.eup %1218 }
0x12e3   :  { %v807_v13 = vmul.f32 0.5, %v1219_v11 }
0x12e5   :  { %v808_v15 = vadd.f32 0.5, %v807_v13 }
0x12e7   :  { %v810_v18 = vmul.f32 %v808_v15, %v776_v59 }
0x1353   :  { %v813_v16 = vpop.permute.xlu0 %812 }
0x1354   :  { %v815_v17 = vmul.f32 %v813_v16, %v808_v15 }
0x1356   :  { %817 = vrot.lane.b32.xlu1 %v815_v17, %s1285_s11 }
0x13c8   :  { %v818_v19 = vpop.permute.xlu1 %817 }
0x13c9   :  { %v820_v20 = vadd.f32 %v818_v19, %v810_v18 }
0x13cb   :  { %1220 = vtanh.f32 %v820_v20 }
0x13d1   :  { %v1221_v21 = vpop.eup %1220 }
0x13d2   :  { %823 = vrot.lane.b32.xlu2 %v1221_v21, %s1285_s11 }
0x142c   :  { %v824_v22 = vpop.permute.xlu2 %823 }
0x142d   :  { %v826_v25 = vmul.f32 %v824_v22, %v808_v15 }
0x142f   :  { %v828_v26 = vpack.c.bf16 %v826_v25, %v826_v25 }
0x1431   :  { %830 = vrot.lane.b32.xlu0 %v828_v26, %s1286_s3 }
0x14a3   :  { %v831_v27 = vpop.permute.xlu0 %830 }
0x14a4   :  { %1138 = vmatmul.msk.bf16.vlgmr.msra.gmra.mxu1 %vm32_vm1, %v831_v27 }
0x1521   :  { %v844_v30 = vpop.f32.mrf.mxu1 }
0x1522   :  { %v848_v31 = vadd.f32 %v844_v30, %v658_v29 }
0x1524   :  { %1222 = vtanh.f32 %v848_v31  ;;  %v849_v35 = vmul.f32 0.5, %v848_v31 }
0x1526   :  { %1224 = vtanh.f32 %v849_v35 }
0x1529   :  { %v846_v33 = vpop.f32.mrf.mxu1 }
0x152a   :  { %v1223_v32 = vpop.eup %1222 }
0x152b   :  { %856 = vrot.lane.b32.xlu1 %v1223_v32, %s1285_s11 }
0x152c   :  { %v1225_v36 = vpop.eup %1224 }
0x152d   :  { %v851_v37 = vmul.f32 0.5, %v1225_v36 }
0x152f   :  { %v852_v38 = vadd.f32 0.5, %v851_v37 }
0x1531   :  { %v854_v42 = vmul.f32 %v852_v38, %v820_v20 }
0x1533   :  { %406 = vrot.lane.b32.xlu1 %v1432_v12, %s1286_s3 }
0x159d   :  { %v857_v39 = vpop.permute.xlu1 %856 }
0x159e   :  { %v859_v0 = vmul.f32 %v857_v39, %v852_v38 }
0x15a0   :  { %861 = vrot.lane.b32.xlu2 %v859_v0, %s1285_s11 }
0x15a5   :  { %v407_v41 = vpop.permute.xlu1 %406 }
0x15a6   :  { %410 = vst.msk [vmem:[#allocation4 + $0x10] sm:$0xf] %vm201_vm3, %v407_v41 }
0x15a8   :  { %458 = vrot.lane.b32.xlu2 %v1462_v45, %s1286_s3 }
0x15fa   :  { %v862_v43 = vpop.permute.xlu2 %861 }
0x15fb   :  { %v864_v44 = vadd.f32 %v862_v43, %v854_v42 }
0x15fd   :  { %1226 = vtanh.f32 %v864_v44 }
0x1602   :  { %v459_v12 = vpop.permute.xlu2 %458 }
0x1603   :  { %v1227_v46 = vpop.eup %1226  ;;  %462 = vst.msk [vmem:[#allocation4 + $0x14] sm:$0xf] %vm201_vm3, %v459_v12 }
0x1604   :  { %867 = vrot.lane.b32.xlu0 %v1227_v46, %s1285_s11 }
0x160a   :  { %v1151_v47 = vld [vmem:[#allocation4 + $0x10] sm:$0xff] }
0x160b   :  { %1125 = vmatmul.msk.bf16.gmra.mxu3 %vm32_vm1, %v1151_v47 }
0x1676   :  { %v868_v48 = vpop.permute.xlu0 %867 }
0x1677   :  { %v870_v49 = vmul.f32 %v868_v48, %v852_v38 }
0x1679   :  { %v872_v50 = vpack.c.bf16 %v870_v49, %v870_v49 }
0x167b   :  { %874 = vrot.lane.b32.xlu0 %v872_v50, %s1286_s3 }
0x168e   :  { %v660_v45 = vpop.f32.mrf.mxu3 }
0x168f   :  { %v661_v52 = vadd.f32 %v1497_v62, %v660_v45 }
0x1696   :  { %v662_v17 = vpop.f32.mrf.mxu3 }
0x1697   :  { %v663_v18 = vadd.f32 %v1497_v62, %v662_v17 }
0x16ed   :  { %v875_v51 = vpop.permute.xlu0 %874 }
0x16ee   :  { %1139 = vmatmul.msk.bf16.vlgmr.msra.gmra.mxu2 %vm32_vm1, %v875_v51 }
0x1771   :  { %v888_v54 = vpop.f32.mrf.mxu2 }
0x1772   :  { %v892_v55 = vadd.f32 %v888_v54, %v661_v52 }
0x1774   :  { %1228 = vtanh.f32 %v892_v55  ;;  %v893_v58 = vmul.f32 0.5, %v892_v55 }
0x1776   :  { %1230 = vtanh.f32 %v893_v58 }
0x1777   :  { %1232 = vtanh.f32 %v537_v63 }
0x1779   :  { %v890_v56 = vpop.f32.mrf.mxu2 }
0x177a   :  { %v1229_v57 = vpop.eup %1228 }
0x177b   :  { %900 = vrot.lane.b32.xlu1 %v1229_v57, %s1285_s11 }
0x177c   :  { %v1231_v59 = vpop.eup %1230 }
0x177d   :  { %v895_v23 = vmul.f32 0.5, %v1231_v59  ;;  %v1233_v3 = vpop.eup %1232 }
0x177f   :  { %v896_v61 = vadd.f32 0.5, %v895_v23 }
0x1781   :  { %v898_v4 = vmul.f32 %v896_v61, %v864_v44 }
0x17ed   :  { %v901_v1 = vpop.permute.xlu1 %900 }
0x17ee   :  { %v903_v2 = vmul.f32 %v901_v1, %v896_v61 }
0x17f0   :  { %905 = vrot.lane.b32.xlu2 %v903_v2, %s1285_s11 }
0x17f8   :  { %545 = vrot.lane.b32.xlu2 %v1233_v3, %s1285_s11 }
0x184a   :  { %v906_v5 = vpop.permute.xlu2 %905 }
0x184b   :  { %v908_v6 = vadd.f32 %v906_v5, %v898_v4 }
0x184d   :  { %1234 = vtanh.f32 %v908_v6 }
0x184e   :  { %1236 = vtanh.f32 %v538_v8 }
0x1852   :  { %v546_v11 = vpop.permute.xlu2 %545 }
0x1853   :  { %v1235_v7 = vpop.eup %1234 }
0x1854   :  { %911 = vrot.lane.b32.xlu0 %v1235_v7, %s1285_s11  ;;  %v1237_v40 = vpop.eup %1236 }
0x1855   :  { %v540_v10 = vmul.f32 0.5, %v1237_v40 }
0x1857   :  { %v541_v13 = vadd.f32 0.5, %v540_v10 }
0x1859   :  { %v548_v15 = vmul.f32 %v546_v11, %v541_v13  ;;  %v543_v22 = vmul.f32 %v541_v13, %v1505_v24 }
0x18c6   :  { %v912_v14 = vpop.permute.xlu0 %911 }
0x18c7   :  { %v914_v53 = vmul.f32 %v912_v14, %v896_v61 }
0x18c9   :  { %v916_v9 = vpack.c.bf16 %v914_v53, %v914_v53 }
0x18cb   :  { %918 = vrot.lane.b32.xlu1 %v916_v9, %s1286_s3 }
0x18d3   :  { %550 = vrot.lane.b32.xlu1 %v548_v15, %s1285_s11 }
0x193d   :  { %v919_v16 = vpop.permute.xlu1 %918 }
0x193e   :  { %1140 = vmatmul.msk.bf16.vlgmr.msra.gmra.mxu0 %vm32_vm1, %v919_v16 }
0x1945   :  { %v551_v21 = vpop.permute.xlu1 %550 }
0x1946   :  { %v1570_v25 = vadd.f32 %v551_v21, %v543_v22 }
0x19bb   :  { %v932_v19 = vpop.f32.mrf.mxu0 }
0x19bc   :  { %v936_v20 = vadd.f32 %v932_v19, %v663_v18 }
0x19be   :  { %1238 = vtanh.f32 %v936_v20  ;;  %v937_v29 = vmul.f32 0.5, %v936_v20 }
0x19bf   :  { %1240 = vtanh.f32 %v1570_v25 }
0x19c0   :  { %1242 = vtanh.f32 %v937_v29 }
0x19c3   :  { %v934_v26 = vpop.f32.mrf.mxu0 }
0x19c4   :  { %v1239_v27 = vpop.eup %1238 }
0x19c5   :  { %944 = vrot.lane.b32.xlu0 %v1239_v27, %s1285_s11  ;;  %v1241_v28 = vpop.eup %1240 }
0x19c6   :  { %v1243_v30 = vpop.eup %1242 }
0x19c7   :  { %v939_v31 = vmul.f32 0.5, %v1243_v30 }
0x19c9   :  { %v940_v33 = vadd.f32 0.5, %v939_v31 }
0x19cb   :  { %v942_v38 = vmul.f32 %v940_v33, %v908_v6 }
0x19cd   :  { %556 = vrot.lane.b32.xlu0 %v1241_v28, %s1285_s11 }
0x1a37   :  { %v945_v32 = vpop.permute.xlu0 %944 }
0x1a38   :  { %v947_v35 = vmul.f32 %v945_v32, %v940_v33 }
0x1a3a   :  { %949 = vrot.lane.b32.xlu2 %v947_v35, %s1285_s11 }
0x1a3f   :  { %v557_v24 = vpop.permute.xlu0 %556 }
0x1a40   :  { %v559_v36 = vmul.f32 %v557_v24, %v541_v13 }
0x1a42   :  { %v560_v37 = vpack.c.bf16 %v559_v36, %v559_v36  ;;  %510 = vrot.lane.b32.xlu2 %v1510_v34, %s1286_s3 }
0x1a44   :  { %562 = vrot.lane.b32.xlu0 %v560_v37, %s1286_s3 }
0x1a94   :  { %v950_v39 = vpop.permute.xlu2 %949 }
0x1a95   :  { %v952_v0 = vadd.f32 %v950_v39, %v942_v38 }
0x1a97   :  { %1244 = vtanh.f32 %v952_v0 }
0x1a9c   :  { %v511_v41 = vpop.permute.xlu2 %510 }
0x1a9d   :  { %v1245_v42 = vpop.eup %1244  ;;  %514 = vst.msk [vmem:[#allocation4 + $0x18] sm:$0xf] %vm201_vm3, %v511_v41 }
0x1a9e   :  { %955 = vrot.lane.b32.xlu1 %v1245_v42, %s1285_s11 }
0x1ab6   :  { %v563_v43 = vpop.permute.xlu0 %562 }
0x1ab7   :  { %566 = vst.msk [vmem:[#allocation4 + $0x1c] sm:$0xf] %vm201_vm3, %v563_v43 }
0x1abe   :  { %v1152_v44 = vld [vmem:[#allocation4 + $0x18] sm:$0xff] }
0x1abf   :  { %1126 = vmatmul.msk.bf16.gmra.mxu3 %vm32_vm1, %v1152_v44 }
0x1b10   :  { %v956_v12 = vpop.permute.xlu1 %955 }
0x1b11   :  { %v958_v34 = vmul.f32 %v956_v12, %v940_v33 }
0x1b13   :  { %v960_v46 = vpack.c.bf16 %v958_v34, %v958_v34 }
0x1b15   :  { %962 = vrot.lane.b32.xlu1 %v960_v46, %s1286_s3 }
0x1b42   :  { %v665_v48 = vpop.f32.mrf.mxu3 }
0x1b43   :  { %v666_v49 = vadd.f32 %v1497_v62, %v665_v48 }
0x1b4a   :  { %v667_v5 = vpop.f32.mrf.mxu3 }
0x1b4b   :  { %v668_v6 = vadd.f32 %v1497_v62, %v667_v5 }
0x1b87   :  { %v963_v47 = vpop.permute.xlu1 %962 }
0x1b88   :  { %1141 = vmatmul.msk.bf16.vlgmr.msrb.gmra.mxu1 %vm32_vm1, %v963_v47 }
0x1c05   :  { %v976_v50 = vpop.f32.mrf.mxu1 }
0x1c06   :  { %v980_v51 = vadd.f32 %v976_v50, %v666_v49 }
0x1c08   :  { %1246 = vtanh.f32 %v980_v51  ;;  %v981_v54 = vmul.f32 0.5, %v980_v51 }
0x1c0a   :  { %1248 = vtanh.f32 %v981_v54 }
0x1c0d   :  { %v978_v45 = vpop.f32.mrf.mxu1 }
0x1c0e   :  { %v1247_v52 = vpop.eup %1246 }
0x1c0f   :  { %988 = vrot.lane.b32.xlu2 %v1247_v52, %s1285_s11 }
0x1c10   :  { %v1249_v55 = vpop.eup %1248 }
0x1c11   :  { %v983_v56 = vmul.f32 0.5, %v1249_v55 }
0x1c13   :  { %v984_v57 = vadd.f32 0.5, %v983_v56 }
0x1c15   :  { %v986_v23 = vmul.f32 %v984_v57, %v952_v0 }
0x1c69   :  { %v989_v58 = vpop.permute.xlu2 %988 }
0x1c6a   :  { %v991_v59 = vmul.f32 %v989_v58, %v984_v57 }
0x1c6c   :  { %993 = vrot.lane.b32.xlu0 %v991_v59, %s1285_s11 }
0x1cde   :  { %v994_v60 = vpop.permute.xlu0 %993 }
0x1cdf   :  { %v996_v61 = vadd.f32 %v994_v60, %v986_v23 }
0x1ce1   :  { %1250 = vtanh.f32 %v996_v61 }
0x1ce7   :  { %v1251_v63 = vpop.eup %1250 }
0x1ce8   :  { %999 = vrot.lane.b32.xlu1 %v1251_v63, %s1285_s11 }
0x1d5a   :  { %v1000_v1 = vpop.permute.xlu1 %999 }
0x1d5b   :  { %v1002_v2 = vmul.f32 %v1000_v1, %v984_v57 }
0x1d5d   :  { %v1004_v3 = vpack.c.bf16 %v1002_v2, %v1002_v2 }
0x1d5f   :  { %1006 = vrot.lane.b32.xlu2 %v1004_v3, %s1286_s3 }
0x1db9   :  { %v1007_v4 = vpop.permute.xlu2 %1006 }
0x1dba   :  { %1142 = vmatmul.msk.bf16.vlgmr.msrb.gmra.mxu2 %vm32_vm1, %v1007_v4 }
0x1e3d   :  { %v1020_v7 = vpop.f32.mrf.mxu2 }
0x1e3e   :  { %v1024_v8 = vadd.f32 %v1020_v7, %v668_v6 }
0x1e40   :  { %1252 = vtanh.f32 %v1024_v8  ;;  %v1025_v40 = vmul.f32 0.5, %v1024_v8 }
0x1e42   :  { %1254 = vtanh.f32 %v1025_v40 }
0x1e45   :  { %v1022_v14 = vpop.f32.mrf.mxu2 }
0x1e46   :  { %v1253_v53 = vpop.eup %1252 }
0x1e47   :  { %1032 = vrot.lane.b32.xlu0 %v1253_v53, %s1285_s11 }
0x1e48   :  { %v1255_v9 = vpop.eup %1254 }
0x1e49   :  { %v1027_v10 = vmul.f32 0.5, %v1255_v9 }
0x1e4b   :  { %v1028_v11 = vadd.f32 0.5, %v1027_v10 }
0x1e4d   :  { %v1030_v17 = vmul.f32 %v1028_v11, %v996_v61 }
0x1e4f   :  { %568 = vrot.lane.b32.xlu0 %v559_v36, %s1286_s3 }
0x1eb9   :  { %v1033_v13 = vpop.permute.xlu0 %1032 }
0x1eba   :  { %v1035_v15 = vmul.f32 %v1033_v13, %v1028_v11 }
0x1ebc   :  { %1037 = vrot.lane.b32.xlu1 %v1035_v15, %s1285_s11 }
0x1ec1   :  { %v569_v16 = vpop.permute.xlu0 %568 }
0x1ec2   :  { %571 = vst.msk [vmem:[#allocation2] sm:$0xff] %vm32_vm1, %v569_v16 }
0x1ec9   :  { %v1057_v62 = vld [vmem:[#allocation2] sm:$0xff] }
0x1eca   :  { %1059 = vst.msk [vmem:[#allocation6] sm:$0xff] %vm32_vm1, %v1057_v62 }
0x1f2e   :  { %v1038_v18 = vpop.permute.xlu1 %1037 }
0x1f2f   :  { %v1040_v19 = vadd.f32 %v1038_v18, %v1030_v17 }
0x1f31   :  { %1256 = vtanh.f32 %v1040_v19  ;;  %1053 = vrot.lane.b32.xlu0 %v1040_v19, %s1287_s6 }
0x1f37   :  { %v1257_v20 = vpop.eup %1256 }
0x1f38   :  { %1043 = vrot.lane.b32.xlu2 %v1257_v20, %s1285_s11  ;;  %s1289_s11 = smov 128  }
0x1f40   :  { %573 = vrot.lane.b32.xlu2 %v1570_v25, %s1287_s6 }
0x1f92   :  { %v1044_v21 = vpop.permute.xlu2 %1043 }
0x1f93   :  { %v1046_v22 = vmul.f32 %v1044_v21, %v1028_v11 }
0x1f95   :  { %1048 = vrot.lane.b32.xlu1 %v1046_v22, %s1286_s3  ;;  %s1290_s3 = smov 8  }
0x1f9a   :  { %v574_v26 = vpop.permute.xlu2 %573 }
0x1f9b   :  { %576 = vst.msk [vmem:[#allocation3] sm:$0xff] %vm32_vm1, %v574_v26 }
0x1fa3   :  { %v1054_v27 = vpop.permute.xlu0 %1053 }
0x1fa4   :  { %1056 = vst.msk [vmem:[#allocation3 + $0x8] sm:$0xff] %vm32_vm1, %v1054_v27 }
0x2007   :  { %v1049_v28 = vpop.permute.xlu1 %1048 }
0x2008   :  { %1051 = vst.msk [vmem:[#allocation2 + $0x8] sm:$0xff] %vm32_vm1, %v1049_v28 }
0x200f   :  { %v1058_v25 = vld [vmem:[#allocation2 + $0x8] sm:$0xff] }
0x2010   :  { %1060 = vst.msk [vmem:[#allocation6 + $0x8] sm:$0xff] %vm32_vm1, %v1058_v25 }
0x2011   :  { %1073 = dma.vmem_to_hbm [thread:$0]  %s1066_s1, 256, %s1068_s10, [#allocation7], %s1289_s11, %s1289_s11, %s1290_s3  }
0x2012   :  { %1282 = dma.done.wait [#allocation7], 256  }
0x2013   :  { %1283 = vsyncadd [#allocation7], 4294967040 }
0x2014   :  { %1078 = vsyncpa [#allocation7], 1 }

</bundles_post_ra>
